<compile_context>
chip_gen: v6e
topology: v6e:2x2x1
jax: 0.10.0
libtpu: 0.0.40
codegen_flags: <defaults>
</compile_context>

<pallas_src>
import numpy as np
import jax
import jax.numpy as jnp
from jax import lax
from jax.experimental import pallas as pl
from jax.experimental.pallas import tpu as pltpu

# ---- model / problem sizes (small, consistent with the module) --------------
T, B = 8, 4            # seq length, batch
VOCAB = 20             # input_dim
E = 16                 # emb_dim
H = 16                 # enc_hid_dim (per direction)
D = 16                 # dec_hid_dim
DROPOUT = 0.5          # identity at eval time

_VMEM = pl.BlockSpec(memory_space=pltpu.MemorySpace.VMEM)
_HI = lax.Precision.HIGHEST


# ---------------------------- fused Pallas kernel -----------------------------
def encoder_kernel(src_f_ref, src_b_ref, len_ref, table_ref, whh_ref,
                   bhhn_ref, fcw_ref, fcb_ref, out_ref, hid_ref):
    """Fused encoder forward pass.

    src_f_ref : (T*B, 1) int32   forward-time token ids, row = t*B + b
    src_b_ref : (T*B, 1) int32   time-REVERSED token ids (backward direction)
    len_ref   : (B, 1)   int32   valid lengths per batch element
    table_ref : (2*VOCAB, 6H)    fused [embedding @ W_ih + biases] lookup table,
                                 rows 0:V forward, V:2V backward;
                                 columns [r_f r_b z_f z_b n_f n_b]
    whh_ref   : (2H, 6H)         block-diagonal combined recurrent weights
    bhhn_ref  : (1, 2H)          recurrent bias of the n gate (not foldable)
    fcw_ref   : (2H, D), fcb_ref : (1, D)
    out_ref   : (B, T*2H)        lane-dense padded bi-GRU outputs
    hid_ref   : (B, D)           tanh(fc([h_fwd_final, h_bwd_final]))
    """
    tb = src_f_ref.shape[0]
    batch = len_ref.shape[0]
    t_steps = tb // batch
    two_h = whh_ref.shape[0]
    hid = two_h // 2
    two_vocab = table_ref.shape[0]
    vocab = two_vocab // 2

    # ---- off-chain: fused embedding lookup + input projection (one MXU op) ----
    # One row per (step, batch): first VOCAB lanes one-hot the forward token,
    # next VOCAB lanes one-hot the (pre-reversed) backward token.  The table has
    # b_ih (all gates) and b_hh (r/z gates) folded in, so gi_all is complete.
    col = lax.broadcasted_iota(jnp.int32, (tb, two_vocab), 1)
    onehot = ((src_f_ref[...] == col) |
              ((src_b_ref[...] + vocab) == col)).astype(jnp.float32)
    gi_all = jnp.dot(onehot, table_ref[...],
                     preferred_element_type=jnp.float32)            # (T*B, 6H)

    # ---- off-chain: per-step slices + validity masks (hoisted out of loop) -----
    lens = len_ref[...]                                             # (B, 1) int32
    lane = lax.broadcasted_iota(jnp.int32, (batch, two_h), 1)
    whh = whh_ref[...]
    bhh_n = jnp.broadcast_to(bhhn_ref[...], (batch, two_h))

    gi_rz, gi_n, valid = [], [], []
    for s in range(t_steps):
        g = gi_all[s * batch:(s + 1) * batch]                       # (B, 6H)
        gi_rz.append(g[:, :4 * hid])                                # [r_f r_b z_f z_b]
        gi_n.append(g[:, 4 * hid:])                                 # [n_f n_b]
        # lanes [0,H) = forward direction (time s), lanes [H,2H) = backward
        # direction (time T-1-s); padded steps emit 0 and carry the state.
        thresh = jnp.where(lane < hid, s, t_steps - 1 - s)
        valid.append(lens > thresh)                                 # (B, 2H) bool

    # ---- serial recurrence: one MXU op + one sigmoid + one tanh per step -------
    h = jnp.zeros((batch, two_h), jnp.float32)                      # [h_fwd | h_bwd]
    fwd = [None] * t_steps
    bwd = [None] * t_steps
    for s in range(t_steps):                 # fully unrolled (static trip count)
        gh = jnp.dot(h, whh, preferred_element_type=jnp.float32)    # (B, 6H)
        rz = jax.nn.sigmoid(gi_rz[s] + gh[:, :4 * hid])             # (B, 4H)
        r = rz[:, :two_h]                                           # [r_f | r_b]
        z = rz[:, two_h:]                                           # [z_f | z_b]
        n = jnp.tanh(gi_n[s] + r * (gh[:, 4 * hid:] + bhh_n))       # (B, 2H)
        h_new = (1.0 - z) * n + z * h
        out_s = jnp.where(valid[s], h_new, 0.0)
        h = jnp.where(valid[s], h_new, h)
        fwd[s] = out_s[:, :hid]                   # forward output at time s
        bwd[t_steps - 1 - s] = out_s[:, hid:]     # backward output at time T-1-s

    # ---- lane-dense bulk stores (one unmasked vst for the whole sequence) ------
    out_ref[...] = jnp.concatenate(
        [jnp.concatenate([fwd[t], bwd[t]], axis=-1) for t in range(t_steps)],
        axis=-1)                                                    # (B, T*2H)

    # final hidden: tanh(fc([h_fwd, h_bwd])) — fused, no second pallas_call
    hid_ref[...] = jnp.tanh(
        jnp.dot(h, fcw_ref[...], preferred_element_type=jnp.float32) + fcb_ref[...])


# ------------------------------ wrapper ---------------------------------------
def _pack_fused(p):
    """Pack per-direction GRU weights into the fused kernel layout.

    Combined gate/lane order: [r_f, r_b, z_f, z_b, n_f, n_b].
    table_c rows 0:V carry the forward input projection (emb @ W_ih_f) plus ALL
    per-row biases (b_ih both dirs + b_hh for r/z); rows V:2V carry the backward
    projection.  whh_c is block-diagonal in direction so h = [h_f | h_b] needs
    exactly one matmul per step.  Only b_hh_n stays separate (it is gated by r).
    """
    hid = p["whh_f"].shape[0]
    emb = p["embedding"]
    vocab = emb.shape[0]
    dt = emb.dtype

    def split3(w):   # (in, 3H) gate order [r, z, n]
        return w[:, :hid], w[:, hid:2 * hid], w[:, 2 * hid:]

    tf_r, tf_z, tf_n = split3(jnp.dot(emb, p["wih_f"], precision=_HI))
    tb_r, tb_z, tb_n = split3(jnp.dot(emb, p["wih_b"], precision=_HI))
    bif_r, bif_z, bif_n = split3(p["bih_f"])
    bib_r, bib_z, bib_n = split3(p["bih_b"])
    bhf_r, bhf_z, bhf_n = split3(p["bhh_f"])
    bhb_r, bhb_z, bhb_n = split3(p["bhh_b"])

    bias = jnp.concatenate([bif_r + bhf_r, bib_r + bhb_r,
                            bif_z + bhf_z, bib_z + bhb_z,
                            bif_n,         bib_n], axis=1)                  # (1, 6H)
    zv = jnp.zeros((vocab, hid), dt)
    fwd_rows = jnp.concatenate([tf_r, zv, tf_z, zv, tf_n, zv], axis=1) + bias
    bwd_rows = jnp.concatenate([zv, tb_r, zv, tb_z, zv, tb_n], axis=1)
    table_c = jnp.concatenate([fwd_rows, bwd_rows], axis=0)                 # (2V, 6H)

    whf_r, whf_z, whf_n = split3(p["whh_f"])
    whb_r, whb_z, whb_n = split3(p["whh_b"])
    zh = jnp.zeros((hid, hid), dt)
    whh_c = jnp.concatenate(
        [jnp.concatenate([whf_r, zh, whf_z, zh, whf_n, zh], axis=1),
         jnp.concatenate([zh, whb_r, zh, whb_z, zh, whb_n], axis=1)],
        axis=0)                                                             # (2H, 6H)

    bhh_n = jnp.concatenate([bhf_n, bhb_n], axis=1)                         # (1, 2H)
    return table_c, whh_c, bhh_n


@jax.jit
def encoder_forward(params, src, src_len):
    t_steps, batch = src.shape
    hid = params["whh_f"].shape[0]
    dec = params["fc_w"].shape[1]
    b_pad = ((batch + 7) // 8) * 8          # full 8-sublane tile for the MXU/VPU
    pad = b_pad - batch

    table_c, whh_c, bhh_n = _pack_fused(params)

    src_p = jnp.pad(src.astype(jnp.int32), ((0, 0), (0, pad)))
    len_p = jnp.pad(src_len.astype(jnp.int32), (0, pad)).reshape(b_pad, 1)
    src_f = src_p.reshape(t_steps * b_pad, 1)                      # row = t*B + b
    src_b = jnp.flip(src_p, axis=0).reshape(t_steps * b_pad, 1)    # time reversed

    out_shapes = (
        jax.ShapeDtypeStruct((b_pad, t_steps * 2 * hid), jnp.float32),  # lane-dense
        jax.ShapeDtypeStruct((b_pad, dec), jnp.float32),                # hidden
    )
    out_flat, hid_p = pl.pallas_call(
        encoder_kernel,
        out_shape=out_shapes,
        in_specs=[_VMEM] * 8,
        out_specs=(_VMEM, _VMEM),
    )(src_f, src_b, len_p, table_c, whh_c, bhh_n,
      params["fc_w"], params["fc_b"])

    # layout plumbing only (metadata-ish, outside the kernel)
    outputs = out_flat.reshape(b_pad, t_steps, 2 * hid).transpose(1, 0, 2)[:, :batch]
    hidden = hid_p[:batch]
    return outputs, hidden


# --------------------------- parameter init -----------------------------------
def init_params(key):
    ks = jax.random.split(key, 11)

    def u(k, shape, bound):
        return jax.random.uniform(k, shape, jnp.float32, -bound, bound)

    kg = 1.0 / np.sqrt(H)        # PyTorch GRU init bound
    kf = 1.0 / np.sqrt(2 * H)    # PyTorch Linear init bound
    # GRU weights stored pre-transposed: (in_features, 3H), gate order [r, z, n]
    return dict(
        embedding=jax.random.normal(ks[0], (VOCAB, E), jnp.float32),
        wih_f=u(ks[1], (E, 3 * H), kg), whh_f=u(ks[2], (H, 3 * H), kg),
        bih_f=u(ks[3], (1, 3 * H), kg), bhh_f=u(ks[4], (1, 3 * H), kg),
        wih_b=u(ks[5], (E, 3 * H), kg), whh_b=u(ks[6], (H, 3 * H), kg),
        bih_b=u(ks[7], (1, 3 * H), kg), bhh_b=u(ks[8], (1, 3 * H), kg),
        fc_w=u(ks[9], (2 * H, D), kf), fc_b=u(ks[10], (1, D), kf),
    )


# ------------------------- pure-JAX reference ----------------------------------
def _gru_dir_ref(emb, mask, wih, whh, bih, bhh, reverse):
    t_steps, batch, _ = emb.shape
    hid = whh.shape[0]
    h = jnp.zeros((batch, hid), jnp.float32)
    outs = [None] * t_steps
    order = range(t_steps - 1, -1, -1) if reverse else range(t_steps)
    for t in order:
        x, m = emb[t], mask[t]
        gi = jnp.dot(x, wih, precision=_HI) + bih
        gh = jnp.dot(h, whh, precision=_HI) + bhh
        r = jax.nn.sigmoid(gi[:, :hid] + gh[:, :hid])
        z = jax.nn.sigmoid(gi[:, hid:2 * hid] + gh[:, hid:2 * hid])
        n = jnp.tanh(gi[:, 2 * hid:] + r * gh[:, 2 * hid:])
        h_new = (1.0 - z) * n + z * h
        outs[t] = m * h_new
        h = m * h_new + (1.0 - m) * h
    return jnp.stack(outs, 0), h


def encoder_ref(params, src, src_len):
    t_steps = src.shape[0]
    emb = params["embedding"][src].astype(jnp.float32)
    mask = (jnp.arange(t_steps)[:, None] < src_len[None, :]).astype(jnp.float32)[:, :, None]
    of, hf = _gru_dir_ref(emb, mask, params["wih_f"], params["whh_f"],
                          params["bih_f"], params["bhh_f"], reverse=False)
    ob, hb = _gru_dir_ref(emb, mask, params["wih_b"], params["whh_b"],
                          params["bih_b"], params["bhh_b"], reverse=True)
    outputs = jnp.concatenate([of, ob], axis=-1)
    combined = jnp.concatenate([hf, hb], axis=-1)
    hidden = jnp.tanh(jnp.dot(combined, params["fc_w"], precision=_HI) + params["fc_b"])
    return outputs, hidden


# --------------------------------- main ----------------------------------------
if __name__ == "__main__":
    key = jax.random.PRNGKey(0)
    pkey, skey = jax.random.split(key)
    params = init_params(pkey)

    src = jax.random.randint(skey, (T, B), 0, VOCAB, dtype=jnp.int32)   # (T, B)
    src_len = jnp.array([8, 7, 5, 3], dtype=jnp.int32)                  # sorted desc

    outputs, hidden = encoder_forward(params, src, src_len)
    jax.block_until_ready((outputs, hidden))

    ref_out, ref_hid = encoder_ref(params, src, src_len)
    assert outputs.shape == (T, B, 2 * H) and hidden.shape == (B, D)
    assert np.allclose(np.asarray(outputs), np.asarray(ref_out), atol=2e-4, rtol=2e-4)
    assert np.allclose(np.asarray(hidden), np.asarray(ref_hid), atol=2e-4, rtol=2e-4)

    print("KERNEL_OK")
</pallas_src>

<mosaic_0001>
module attributes {stable_mosaic.version = 11 : i64} {
  func.func @encoder_kernel(%arg0: memref<64x1xi32, #tpu.memory_space<vmem>>, %arg1: memref<64x1xi32, #tpu.memory_space<vmem>>, %arg2: memref<8x1xi32, #tpu.memory_space<vmem>>, %arg3: memref<40x96xf32, #tpu.memory_space<vmem>>, %arg4: memref<32x96xf32, #tpu.memory_space<vmem>>, %arg5: memref<1x32xf32, #tpu.memory_space<vmem>>, %arg6: memref<32x16xf32, #tpu.memory_space<vmem>>, %arg7: memref<1x16xf32, #tpu.memory_space<vmem>>, %arg8: memref<8x256xf32, #tpu.memory_space<vmem>>, %arg9: memref<8x16xf32, #tpu.memory_space<vmem>>) attributes {dimension_semantics = [], scalar_prefetch = 0 : i64, scratch_operands = 0 : i64, tpu.core_type = #tpu.core_type<tc>} {
    %0 = tpu.iota {dimensions = array<i32: 1>} : vector<64x40xi32>
    %c0 = arith.constant 0 : index
    %c0_0 = arith.constant 0 : index
    %1 = vector.load %arg0[%c0, %c0_0] : memref<64x1xi32, #tpu.memory_space<vmem>>, vector<64x1xi32>
    %2 = vector.broadcast %1 : vector<64x1xi32> to vector<64x40xi32>
    %3 = arith.cmpi eq, %2, %0 : vector<64x40xi32>
    %c0_1 = arith.constant 0 : index
    %c0_2 = arith.constant 0 : index
    %4 = vector.load %arg1[%c0_1, %c0_2] : memref<64x1xi32, #tpu.memory_space<vmem>>, vector<64x1xi32>
    %c20_i32 = arith.constant 20 : i32
    %5 = vector.broadcast %c20_i32 : i32 to vector<64x1xi32>
    %6 = arith.addi %4, %5 : vector<64x1xi32>
    %7 = vector.broadcast %6 : vector<64x1xi32> to vector<64x40xi32>
    %8 = arith.cmpi eq, %7, %0 : vector<64x40xi32>
    %9 = arith.ori %3, %8 : vector<64x40xi1>
    %10 = arith.extui %9 : vector<64x40xi1> to vector<64x40xi32>
    %11 = arith.sitofp %10 : vector<64x40xi32> to vector<64x40xf32>
    %c0_3 = arith.constant 0 : index
    %c0_4 = arith.constant 0 : index
    %12 = vector.load %arg3[%c0_3, %c0_4] : memref<40x96xf32, #tpu.memory_space<vmem>>, vector<40x96xf32>
    %cst = arith.constant dense<0.000000e+00> : vector<64x96xf32>
    %13 = tpu.matmul %11, %12, %cst {dimension_numbers = #tpu.dot_dimension_numbers<[1], [0], [0], [1], [0, 0, 1, 1], [], []>} : vector<64x40xf32>, vector<40x96xf32>, vector<64x96xf32> -> vector<64x96xf32>
    %c0_5 = arith.constant 0 : index
    %c0_6 = arith.constant 0 : index
    %14 = vector.load %arg2[%c0_5, %c0_6] : memref<8x1xi32, #tpu.memory_space<vmem>>, vector<8x1xi32>
    %15 = tpu.iota {dimensions = array<i32: 1>} : vector<8x32xi32>
    %c0_7 = arith.constant 0 : index
    %c0_8 = arith.constant 0 : index
    %16 = vector.load %arg4[%c0_7, %c0_8] : memref<32x96xf32, #tpu.memory_space<vmem>>, vector<32x96xf32>
    %c0_9 = arith.constant 0 : index
    %c0_10 = arith.constant 0 : index
    %17 = vector.load %arg5[%c0_9, %c0_10] : memref<1x32xf32, #tpu.memory_space<vmem>>, vector<1x32xf32>
    %18 = vector.shape_cast %17 : vector<1x32xf32> to vector<1x32xf32>
    %19 = vector.broadcast %18 : vector<1x32xf32> to vector<8x32xf32>
    %20 = vector.extract_strided_slice %13 {offsets = [0, 0], sizes = [8, 96], strides = [1, 1]} : vector<64x96xf32> to vector<8x96xf32>
    %21 = vector.extract_strided_slice %20 {offsets = [0, 0], sizes = [8, 64], strides = [1, 1]} : vector<8x96xf32> to vector<8x64xf32>
    %22 = vector.extract_strided_slice %20 {offsets = [0, 64], sizes = [8, 32], strides = [1, 1]} : vector<8x96xf32> to vector<8x32xf32>
    %c16_i32 = arith.constant 16 : i32
    %23 = vector.broadcast %c16_i32 : i32 to vector<8x32xi32>
    %24 = arith.cmpi slt, %15, %23 : vector<8x32xi32>
    %c0_i32 = arith.constant 0 : i32
    %c7_i32 = arith.constant 7 : i32
    %25 = vector.broadcast %c0_i32 : i32 to vector<8x32xi32>
    %26 = vector.broadcast %c7_i32 : i32 to vector<8x32xi32>
    %27 = arith.select %24, %25, %26 : vector<8x32xi1>, vector<8x32xi32>
    %28 = vector.broadcast %14 : vector<8x1xi32> to vector<8x32xi32>
    %29 = arith.cmpi sgt, %28, %27 : vector<8x32xi32>
    %30 = vector.extract_strided_slice %13 {offsets = [8, 0], sizes = [8, 96], strides = [1, 1]} : vector<64x96xf32> to vector<8x96xf32>
    %31 = vector.extract_strided_slice %30 {offsets = [0, 0], sizes = [8, 64], strides = [1, 1]} : vector<8x96xf32> to vector<8x64xf32>
    %32 = vector.extract_strided_slice %30 {offsets = [0, 64], sizes = [8, 32], strides = [1, 1]} : vector<8x96xf32> to vector<8x32xf32>
    %c16_i32_11 = arith.constant 16 : i32
    %33 = vector.broadcast %c16_i32_11 : i32 to vector<8x32xi32>
    %34 = arith.cmpi slt, %15, %33 : vector<8x32xi32>
    %c1_i32 = arith.constant 1 : i32
    %c6_i32 = arith.constant 6 : i32
    %35 = vector.broadcast %c1_i32 : i32 to vector<8x32xi32>
    %36 = vector.broadcast %c6_i32 : i32 to vector<8x32xi32>
    %37 = arith.select %34, %35, %36 : vector<8x32xi1>, vector<8x32xi32>
    %38 = vector.broadcast %14 : vector<8x1xi32> to vector<8x32xi32>
    %39 = arith.cmpi sgt, %38, %37 : vector<8x32xi32>
    %40 = vector.extract_strided_slice %13 {offsets = [16, 0], sizes = [8, 96], strides = [1, 1]} : vector<64x96xf32> to vector<8x96xf32>
    %41 = vector.extract_strided_slice %40 {offsets = [0, 0], sizes = [8, 64], strides = [1, 1]} : vector<8x96xf32> to vector<8x64xf32>
    %42 = vector.extract_strided_slice %40 {offsets = [0, 64], sizes = [8, 32], strides = [1, 1]} : vector<8x96xf32> to vector<8x32xf32>
    %c16_i32_12 = arith.constant 16 : i32
    %43 = vector.broadcast %c16_i32_12 : i32 to vector<8x32xi32>
    %44 = arith.cmpi slt, %15, %43 : vector<8x32xi32>
    %c2_i32 = arith.constant 2 : i32
    %c5_i32 = arith.constant 5 : i32
    %45 = vector.broadcast %c2_i32 : i32 to vector<8x32xi32>
    %46 = vector.broadcast %c5_i32 : i32 to vector<8x32xi32>
    %47 = arith.select %44, %45, %46 : vector<8x32xi1>, vector<8x32xi32>
    %48 = vector.broadcast %14 : vector<8x1xi32> to vector<8x32xi32>
    %49 = arith.cmpi sgt, %48, %47 : vector<8x32xi32>
    %50 = vector.extract_strided_slice %13 {offsets = [24, 0], sizes = [8, 96], strides = [1, 1]} : vector<64x96xf32> to vector<8x96xf32>
    %51 = vector.extract_strided_slice %50 {offsets = [0, 0], sizes = [8, 64], strides = [1, 1]} : vector<8x96xf32> to vector<8x64xf32>
    %52 = vector.extract_strided_slice %50 {offsets = [0, 64], sizes = [8, 32], strides = [1, 1]} : vector<8x96xf32> to vector<8x32xf32>
    %c16_i32_13 = arith.constant 16 : i32
    %53 = vector.broadcast %c16_i32_13 : i32 to vector<8x32xi32>
    %54 = arith.cmpi slt, %15, %53 : vector<8x32xi32>
    %c3_i32 = arith.constant 3 : i32
    %c4_i32 = arith.constant 4 : i32
    %55 = vector.broadcast %c3_i32 : i32 to vector<8x32xi32>
    %56 = vector.broadcast %c4_i32 : i32 to vector<8x32xi32>
    %57 = arith.select %54, %55, %56 : vector<8x32xi1>, vector<8x32xi32>
    %58 = vector.broadcast %14 : vector<8x1xi32> to vector<8x32xi32>
    %59 = arith.cmpi sgt, %58, %57 : vector<8x32xi32>
    %60 = vector.extract_strided_slice %13 {offsets = [32, 0], sizes = [8, 96], strides = [1, 1]} : vector<64x96xf32> to vector<8x96xf32>
    %61 = vector.extract_strided_slice %60 {offsets = [0, 0], sizes = [8, 64], strides = [1, 1]} : vector<8x96xf32> to vector<8x64xf32>
    %62 = vector.extract_strided_slice %60 {offsets = [0, 64], sizes = [8, 32], strides = [1, 1]} : vector<8x96xf32> to vector<8x32xf32>
    %c16_i32_14 = arith.constant 16 : i32
    %63 = vector.broadcast %c16_i32_14 : i32 to vector<8x32xi32>
    %64 = arith.cmpi slt, %15, %63 : vector<8x32xi32>
    %c4_i32_15 = arith.constant 4 : i32
    %c3_i32_16 = arith.constant 3 : i32
    %65 = vector.broadcast %c4_i32_15 : i32 to vector<8x32xi32>
    %66 = vector.broadcast %c3_i32_16 : i32 to vector<8x32xi32>
    %67 = arith.select %64, %65, %66 : vector<8x32xi1>, vector<8x32xi32>
    %68 = vector.broadcast %14 : vector<8x1xi32> to vector<8x32xi32>
    %69 = arith.cmpi sgt, %68, %67 : vector<8x32xi32>
    %70 = vector.extract_strided_slice %13 {offsets = [40, 0], sizes = [8, 96], strides = [1, 1]} : vector<64x96xf32> to vector<8x96xf32>
    %71 = vector.extract_strided_slice %70 {offsets = [0, 0], sizes = [8, 64], strides = [1, 1]} : vector<8x96xf32> to vector<8x64xf32>
    %72 = vector.extract_strided_slice %70 {offsets = [0, 64], sizes = [8, 32], strides = [1, 1]} : vector<8x96xf32> to vector<8x32xf32>
    %c16_i32_17 = arith.constant 16 : i32
    %73 = vector.broadcast %c16_i32_17 : i32 to vector<8x32xi32>
    %74 = arith.cmpi slt, %15, %73 : vector<8x32xi32>
    %c5_i32_18 = arith.constant 5 : i32
    %c2_i32_19 = arith.constant 2 : i32
    %75 = vector.broadcast %c5_i32_18 : i32 to vector<8x32xi32>
    %76 = vector.broadcast %c2_i32_19 : i32 to vector<8x32xi32>
    %77 = arith.select %74, %75, %76 : vector<8x32xi1>, vector<8x32xi32>
    %78 = vector.broadcast %14 : vector<8x1xi32> to vector<8x32xi32>
    %79 = arith.cmpi sgt, %78, %77 : vector<8x32xi32>
    %80 = vector.extract_strided_slice %13 {offsets = [48, 0], sizes = [8, 96], strides = [1, 1]} : vector<64x96xf32> to vector<8x96xf32>
    %81 = vector.extract_strided_slice %80 {offsets = [0, 0], sizes = [8, 64], strides = [1, 1]} : vector<8x96xf32> to vector<8x64xf32>
    %82 = vector.extract_strided_slice %80 {offsets = [0, 64], sizes = [8, 32], strides = [1, 1]} : vector<8x96xf32> to vector<8x32xf32>
    %c16_i32_20 = arith.constant 16 : i32
    %83 = vector.broadcast %c16_i32_20 : i32 to vector<8x32xi32>
    %84 = arith.cmpi slt, %15, %83 : vector<8x32xi32>
    %c6_i32_21 = arith.constant 6 : i32
    %c1_i32_22 = arith.constant 1 : i32
    %85 = vector.broadcast %c6_i32_21 : i32 to vector<8x32xi32>
    %86 = vector.broadcast %c1_i32_22 : i32 to vector<8x32xi32>
    %87 = arith.select %84, %85, %86 : vector<8x32xi1>, vector<8x32xi32>
    %88 = vector.broadcast %14 : vector<8x1xi32> to vector<8x32xi32>
    %89 = arith.cmpi sgt, %88, %87 : vector<8x32xi32>
    %90 = vector.extract_strided_slice %13 {offsets = [56, 0], sizes = [8, 96], strides = [1, 1]} : vector<64x96xf32> to vector<8x96xf32>
    %91 = vector.extract_strided_slice %90 {offsets = [0, 0], sizes = [8, 64], strides = [1, 1]} : vector<8x96xf32> to vector<8x64xf32>
    %92 = vector.extract_strided_slice %90 {offsets = [0, 64], sizes = [8, 32], strides = [1, 1]} : vector<8x96xf32> to vector<8x32xf32>
    %c16_i32_23 = arith.constant 16 : i32
    %93 = vector.broadcast %c16_i32_23 : i32 to vector<8x32xi32>
    %94 = arith.cmpi slt, %15, %93 : vector<8x32xi32>
    %c7_i32_24 = arith.constant 7 : i32
    %c0_i32_25 = arith.constant 0 : i32
    %95 = vector.broadcast %c7_i32_24 : i32 to vector<8x32xi32>
    %96 = vector.broadcast %c0_i32_25 : i32 to vector<8x32xi32>
    %97 = arith.select %94, %95, %96 : vector<8x32xi1>, vector<8x32xi32>
    %98 = vector.broadcast %14 : vector<8x1xi32> to vector<8x32xi32>
    %99 = arith.cmpi sgt, %98, %97 : vector<8x32xi32>
    %cst_26 = arith.constant 0.000000e+00 : f32
    %100 = vector.broadcast %cst_26 : f32 to vector<8x32xf32>
    %cst_27 = arith.constant dense<0.000000e+00> : vector<8x96xf32>
    %101 = tpu.matmul %100, %16, %cst_27 {dimension_numbers = #tpu.dot_dimension_numbers<[1], [0], [0], [1], [0, 0, 1, 1], [], []>} : vector<8x32xf32>, vector<32x96xf32>, vector<8x96xf32> -> vector<8x96xf32>
    %102 = vector.extract_strided_slice %101 {offsets = [0, 0], sizes = [8, 64], strides = [1, 1]} : vector<8x96xf32> to vector<8x64xf32>
    %103 = arith.addf %21, %102 : vector<8x64xf32>
    %104 = arith.negf %103 : vector<8x64xf32>
    %105 = math.exp %104 : vector<8x64xf32>
    %cst_28 = arith.constant 1.000000e+00 : f32
    %106 = vector.broadcast %cst_28 : f32 to vector<8x64xf32>
    %107 = arith.addf %106, %105 : vector<8x64xf32>
    %108 = arith.divf %106, %107 : vector<8x64xf32>
    %109 = vector.extract_strided_slice %108 {offsets = [0, 0], sizes = [8, 32], strides = [1, 1]} : vector<8x64xf32> to vector<8x32xf32>
    %110 = vector.extract_strided_slice %108 {offsets = [0, 32], sizes = [8, 32], strides = [1, 1]} : vector<8x64xf32> to vector<8x32xf32>
    %111 = vector.extract_strided_slice %101 {offsets = [0, 64], sizes = [8, 32], strides = [1, 1]} : vector<8x96xf32> to vector<8x32xf32>
    %112 = arith.addf %111, %19 : vector<8x32xf32>
    %113 = arith.mulf %109, %112 : vector<8x32xf32>
    %114 = arith.addf %22, %113 : vector<8x32xf32>
    %115 = math.tanh %114 : vector<8x32xf32>
    %cst_29 = arith.constant 1.000000e+00 : f32
    %116 = vector.broadcast %cst_29 : f32 to vector<8x32xf32>
    %117 = arith.subf %116, %110 : vector<8x32xf32>
    %118 = arith.mulf %117, %115 : vector<8x32xf32>
    %119 = arith.mulf %110, %100 : vector<8x32xf32>
    %120 = arith.addf %118, %119 : vector<8x32xf32>
    %cst_30 = arith.constant 0.000000e+00 : f32
    %121 = vector.broadcast %cst_30 : f32 to vector<8x32xf32>
    %122 = arith.select %29, %120, %121 : vector<8x32xi1>, vector<8x32xf32>
    %123 = arith.select %29, %120, %100 : vector<8x32xi1>, vector<8x32xf32>
    %124 = vector.extract_strided_slice %122 {offsets = [0, 0], sizes = [8, 16], strides = [1, 1]} : vector<8x32xf32> to vector<8x16xf32>
    %125 = vector.extract_strided_slice %122 {offsets = [0, 16], sizes = [8, 16], strides = [1, 1]} : vector<8x32xf32> to vector<8x16xf32>
    %cst_31 = arith.constant dense<0.000000e+00> : vector<8x96xf32>
    %126 = tpu.matmul %123, %16, %cst_31 {dimension_numbers = #tpu.dot_dimension_numbers<[1], [0], [0], [1], [0, 0, 1, 1], [], []>} : vector<8x32xf32>, vector<32x96xf32>, vector<8x96xf32> -> vector<8x96xf32>
    %127 = vector.extract_strided_slice %126 {offsets = [0, 0], sizes = [8, 64], strides = [1, 1]} : vector<8x96xf32> to vector<8x64xf32>
    %128 = arith.addf %31, %127 : vector<8x64xf32>
    %129 = arith.negf %128 : vector<8x64xf32>
    %130 = math.exp %129 : vector<8x64xf32>
    %cst_32 = arith.constant 1.000000e+00 : f32
    %131 = vector.broadcast %cst_32 : f32 to vector<8x64xf32>
    %132 = arith.addf %131, %130 : vector<8x64xf32>
    %133 = arith.divf %131, %132 : vector<8x64xf32>
    %134 = vector.extract_strided_slice %133 {offsets = [0, 0], sizes = [8, 32], strides = [1, 1]} : vector<8x64xf32> to vector<8x32xf32>
    %135 = vector.extract_strided_slice %133 {offsets = [0, 32], sizes = [8, 32], strides = [1, 1]} : vector<8x64xf32> to vector<8x32xf32>
    %136 = vector.extract_strided_slice %126 {offsets = [0, 64], sizes = [8, 32], strides = [1, 1]} : vector<8x96xf32> to vector<8x32xf32>
    %137 = arith.addf %136, %19 : vector<8x32xf32>
    %138 = arith.mulf %134, %137 : vector<8x32xf32>
    %139 = arith.addf %32, %138 : vector<8x32xf32>
    %140 = math.tanh %139 : vector<8x32xf32>
    %cst_33 = arith.constant 1.000000e+00 : f32
    %141 = vector.broadcast %cst_33 : f32 to vector<8x32xf32>
    %142 = arith.subf %141, %135 : vector<8x32xf32>
    %143 = arith.mulf %142, %140 : vector<8x32xf32>
    %144 = arith.mulf %135, %123 : vector<8x32xf32>
    %145 = arith.addf %143, %144 : vector<8x32xf32>
    %cst_34 = arith.constant 0.000000e+00 : f32
    %146 = vector.broadcast %cst_34 : f32 to vector<8x32xf32>
    %147 = arith.select %39, %145, %146 : vector<8x32xi1>, vector<8x32xf32>
    %148 = arith.select %39, %145, %123 : vector<8x32xi1>, vector<8x32xf32>
    %149 = vector.extract_strided_slice %147 {offsets = [0, 0], sizes = [8, 16], strides = [1, 1]} : vector<8x32xf32> to vector<8x16xf32>
    %150 = vector.extract_strided_slice %147 {offsets = [0, 16], sizes = [8, 16], strides = [1, 1]} : vector<8x32xf32> to vector<8x16xf32>
    %cst_35 = arith.constant dense<0.000000e+00> : vector<8x96xf32>
    %151 = tpu.matmul %148, %16, %cst_35 {dimension_numbers = #tpu.dot_dimension_numbers<[1], [0], [0], [1], [0, 0, 1, 1], [], []>} : vector<8x32xf32>, vector<32x96xf32>, vector<8x96xf32> -> vector<8x96xf32>
    %152 = vector.extract_strided_slice %151 {offsets = [0, 0], sizes = [8, 64], strides = [1, 1]} : vector<8x96xf32> to vector<8x64xf32>
    %153 = arith.addf %41, %152 : vector<8x64xf32>
    %154 = arith.negf %153 : vector<8x64xf32>
    %155 = math.exp %154 : vector<8x64xf32>
    %cst_36 = arith.constant 1.000000e+00 : f32
    %156 = vector.broadcast %cst_36 : f32 to vector<8x64xf32>
    %157 = arith.addf %156, %155 : vector<8x64xf32>
    %158 = arith.divf %156, %157 : vector<8x64xf32>
    %159 = vector.extract_strided_slice %158 {offsets = [0, 0], sizes = [8, 32], strides = [1, 1]} : vector<8x64xf32> to vector<8x32xf32>
    %160 = vector.extract_strided_slice %158 {offsets = [0, 32], sizes = [8, 32], strides = [1, 1]} : vector<8x64xf32> to vector<8x32xf32>
    %161 = vector.extract_strided_slice %151 {offsets = [0, 64], sizes = [8, 32], strides = [1, 1]} : vector<8x96xf32> to vector<8x32xf32>
    %162 = arith.addf %161, %19 : vector<8x32xf32>
    %163 = arith.mulf %159, %162 : vector<8x32xf32>
    %164 = arith.addf %42, %163 : vector<8x32xf32>
    %165 = math.tanh %164 : vector<8x32xf32>
    %cst_37 = arith.constant 1.000000e+00 : f32
    %166 = vector.broadcast %cst_37 : f32 to vector<8x32xf32>
    %167 = arith.subf %166, %160 : vector<8x32xf32>
    %168 = arith.mulf %167, %165 : vector<8x32xf32>
    %169 = arith.mulf %160, %148 : vector<8x32xf32>
    %170 = arith.addf %168, %169 : vector<8x32xf32>
    %cst_38 = arith.constant 0.000000e+00 : f32
    %171 = vector.broadcast %cst_38 : f32 to vector<8x32xf32>
    %172 = arith.select %49, %170, %171 : vector<8x32xi1>, vector<8x32xf32>
    %173 = arith.select %49, %170, %148 : vector<8x32xi1>, vector<8x32xf32>
    %174 = vector.extract_strided_slice %172 {offsets = [0, 0], sizes = [8, 16], strides = [1, 1]} : vector<8x32xf32> to vector<8x16xf32>
    %175 = vector.extract_strided_slice %172 {offsets = [0, 16], sizes = [8, 16], strides = [1, 1]} : vector<8x32xf32> to vector<8x16xf32>
    %cst_39 = arith.constant dense<0.000000e+00> : vector<8x96xf32>
    %176 = tpu.matmul %173, %16, %cst_39 {dimension_numbers = #tpu.dot_dimension_numbers<[1], [0], [0], [1], [0, 0, 1, 1], [], []>} : vector<8x32xf32>, vector<32x96xf32>, vector<8x96xf32> -> vector<8x96xf32>
    %177 = vector.extract_strided_slice %176 {offsets = [0, 0], sizes = [8, 64], strides = [1, 1]} : vector<8x96xf32> to vector<8x64xf32>
    %178 = arith.addf %51, %177 : vector<8x64xf32>
    %179 = arith.negf %178 : vector<8x64xf32>
    %180 = math.exp %179 : vector<8x64xf32>
    %cst_40 = arith.constant 1.000000e+00 : f32
    %181 = vector.broadcast %cst_40 : f32 to vector<8x64xf32>
    %182 = arith.addf %181, %180 : vector<8x64xf32>
    %183 = arith.divf %181, %182 : vector<8x64xf32>
    %184 = vector.extract_strided_slice %183 {offsets = [0, 0], sizes = [8, 32], strides = [1, 1]} : vector<8x64xf32> to vector<8x32xf32>
    %185 = vector.extract_strided_slice %183 {offsets = [0, 32], sizes = [8, 32], strides = [1, 1]} : vector<8x64xf32> to vector<8x32xf32>
    %186 = vector.extract_strided_slice %176 {offsets = [0, 64], sizes = [8, 32], strides = [1, 1]} : vector<8x96xf32> to vector<8x32xf32>
    %187 = arith.addf %186, %19 : vector<8x32xf32>
    %188 = arith.mulf %184, %187 : vector<8x32xf32>
    %189 = arith.addf %52, %188 : vector<8x32xf32>
    %190 = math.tanh %189 : vector<8x32xf32>
    %cst_41 = arith.constant 1.000000e+00 : f32
    %191 = vector.broadcast %cst_41 : f32 to vector<8x32xf32>
    %192 = arith.subf %191, %185 : vector<8x32xf32>
    %193 = arith.mulf %192, %190 : vector<8x32xf32>
    %194 = arith.mulf %185, %173 : vector<8x32xf32>
    %195 = arith.addf %193, %194 : vector<8x32xf32>
    %cst_42 = arith.constant 0.000000e+00 : f32
    %196 = vector.broadcast %cst_42 : f32 to vector<8x32xf32>
    %197 = arith.select %59, %195, %196 : vector<8x32xi1>, vector<8x32xf32>
    %198 = arith.select %59, %195, %173 : vector<8x32xi1>, vector<8x32xf32>
    %199 = vector.extract_strided_slice %197 {offsets = [0, 0], sizes = [8, 16], strides = [1, 1]} : vector<8x32xf32> to vector<8x16xf32>
    %200 = vector.extract_strided_slice %197 {offsets = [0, 16], sizes = [8, 16], strides = [1, 1]} : vector<8x32xf32> to vector<8x16xf32>
    %cst_43 = arith.constant dense<0.000000e+00> : vector<8x96xf32>
    %201 = tpu.matmul %198, %16, %cst_43 {dimension_numbers = #tpu.dot_dimension_numbers<[1], [0], [0], [1], [0, 0, 1, 1], [], []>} : vector<8x32xf32>, vector<32x96xf32>, vector<8x96xf32> -> vector<8x96xf32>
    %202 = vector.extract_strided_slice %201 {offsets = [0, 0], sizes = [8, 64], strides = [1, 1]} : vector<8x96xf32> to vector<8x64xf32>
    %203 = arith.addf %61, %202 : vector<8x64xf32>
    %204 = arith.negf %203 : vector<8x64xf32>
    %205 = math.exp %204 : vector<8x64xf32>
    %cst_44 = arith.constant 1.000000e+00 : f32
    %206 = vector.broadcast %cst_44 : f32 to vector<8x64xf32>
    %207 = arith.addf %206, %205 : vector<8x64xf32>
    %208 = arith.divf %206, %207 : vector<8x64xf32>
    %209 = vector.extract_strided_slice %208 {offsets = [0, 0], sizes = [8, 32], strides = [1, 1]} : vector<8x64xf32> to vector<8x32xf32>
    %210 = vector.extract_strided_slice %208 {offsets = [0, 32], sizes = [8, 32], strides = [1, 1]} : vector<8x64xf32> to vector<8x32xf32>
    %211 = vector.extract_strided_slice %201 {offsets = [0, 64], sizes = [8, 32], strides = [1, 1]} : vector<8x96xf32> to vector<8x32xf32>
    %212 = arith.addf %211, %19 : vector<8x32xf32>
    %213 = arith.mulf %209, %212 : vector<8x32xf32>
    %214 = arith.addf %62, %213 : vector<8x32xf32>
    %215 = math.tanh %214 : vector<8x32xf32>
    %cst_45 = arith.constant 1.000000e+00 : f32
    %216 = vector.broadcast %cst_45 : f32 to vector<8x32xf32>
    %217 = arith.subf %216, %210 : vector<8x32xf32>
    %218 = arith.mulf %217, %215 : vector<8x32xf32>
    %219 = arith.mulf %210, %198 : vector<8x32xf32>
    %220 = arith.addf %218, %219 : vector<8x32xf32>
    %cst_46 = arith.constant 0.000000e+00 : f32
    %221 = vector.broadcast %cst_46 : f32 to vector<8x32xf32>
    %222 = arith.select %69, %220, %221 : vector<8x32xi1>, vector<8x32xf32>
    %223 = arith.select %69, %220, %198 : vector<8x32xi1>, vector<8x32xf32>
    %224 = vector.extract_strided_slice %222 {offsets = [0, 0], sizes = [8, 16], strides = [1, 1]} : vector<8x32xf32> to vector<8x16xf32>
    %225 = vector.extract_strided_slice %222 {offsets = [0, 16], sizes = [8, 16], strides = [1, 1]} : vector<8x32xf32> to vector<8x16xf32>
    %cst_47 = arith.constant dense<0.000000e+00> : vector<8x96xf32>
    %226 = tpu.matmul %223, %16, %cst_47 {dimension_numbers = #tpu.dot_dimension_numbers<[1], [0], [0], [1], [0, 0, 1, 1], [], []>} : vector<8x32xf32>, vector<32x96xf32>, vector<8x96xf32> -> vector<8x96xf32>
    %227 = vector.extract_strided_slice %226 {offsets = [0, 0], sizes = [8, 64], strides = [1, 1]} : vector<8x96xf32> to vector<8x64xf32>
    %228 = arith.addf %71, %227 : vector<8x64xf32>
    %229 = arith.negf %228 : vector<8x64xf32>
    %230 = math.exp %229 : vector<8x64xf32>
    %cst_48 = arith.constant 1.000000e+00 : f32
    %231 = vector.broadcast %cst_48 : f32 to vector<8x64xf32>
    %232 = arith.addf %231, %230 : vector<8x64xf32>
    %233 = arith.divf %231, %232 : vector<8x64xf32>
    %234 = vector.extract_strided_slice %233 {offsets = [0, 0], sizes = [8, 32], strides = [1, 1]} : vector<8x64xf32> to vector<8x32xf32>
    %235 = vector.extract_strided_slice %233 {offsets = [0, 32], sizes = [8, 32], strides = [1, 1]} : vector<8x64xf32> to vector<8x32xf32>
    %236 = vector.extract_strided_slice %226 {offsets = [0, 64], sizes = [8, 32], strides = [1, 1]} : vector<8x96xf32> to vector<8x32xf32>
    %237 = arith.addf %236, %19 : vector<8x32xf32>
    %238 = arith.mulf %234, %237 : vector<8x32xf32>
    %239 = arith.addf %72, %238 : vector<8x32xf32>
    %240 = math.tanh %239 : vector<8x32xf32>
    %cst_49 = arith.constant 1.000000e+00 : f32
    %241 = vector.broadcast %cst_49 : f32 to vector<8x32xf32>
    %242 = arith.subf %241, %235 : vector<8x32xf32>
    %243 = arith.mulf %242, %240 : vector<8x32xf32>
    %244 = arith.mulf %235, %223 : vector<8x32xf32>
    %245 = arith.addf %243, %244 : vector<8x32xf32>
    %cst_50 = arith.constant 0.000000e+00 : f32
    %246 = vector.broadcast %cst_50 : f32 to vector<8x32xf32>
    %247 = arith.select %79, %245, %246 : vector<8x32xi1>, vector<8x32xf32>
    %248 = arith.select %79, %245, %223 : vector<8x32xi1>, vector<8x32xf32>
    %249 = vector.extract_strided_slice %247 {offsets = [0, 0], sizes = [8, 16], strides = [1, 1]} : vector<8x32xf32> to vector<8x16xf32>
    %250 = vector.extract_strided_slice %247 {offsets = [0, 16], sizes = [8, 16], strides = [1, 1]} : vector<8x32xf32> to vector<8x16xf32>
    %cst_51 = arith.constant dense<0.000000e+00> : vector<8x96xf32>
    %251 = tpu.matmul %248, %16, %cst_51 {dimension_numbers = #tpu.dot_dimension_numbers<[1], [0], [0], [1], [0, 0, 1, 1], [], []>} : vector<8x32xf32>, vector<32x96xf32>, vector<8x96xf32> -> vector<8x96xf32>
    %252 = vector.extract_strided_slice %251 {offsets = [0, 0], sizes = [8, 64], strides = [1, 1]} : vector<8x96xf32> to vector<8x64xf32>
    %253 = arith.addf %81, %252 : vector<8x64xf32>
    %254 = arith.negf %253 : vector<8x64xf32>
    %255 = math.exp %254 : vector<8x64xf32>
    %cst_52 = arith.constant 1.000000e+00 : f32
    %256 = vector.broadcast %cst_52 : f32 to vector<8x64xf32>
    %257 = arith.addf %256, %255 : vector<8x64xf32>
    %258 = arith.divf %256, %257 : vector<8x64xf32>
    %259 = vector.extract_strided_slice %258 {offsets = [0, 0], sizes = [8, 32], strides = [1, 1]} : vector<8x64xf32> to vector<8x32xf32>
    %260 = vector.extract_strided_slice %258 {offsets = [0, 32], sizes = [8, 32], strides = [1, 1]} : vector<8x64xf32> to vector<8x32xf32>
    %261 = vector.extract_strided_slice %251 {offsets = [0, 64], sizes = [8, 32], strides = [1, 1]} : vector<8x96xf32> to vector<8x32xf32>
    %262 = arith.addf %261, %19 : vector<8x32xf32>
    %263 = arith.mulf %259, %262 : vector<8x32xf32>
    %264 = arith.addf %82, %263 : vector<8x32xf32>
    %265 = math.tanh %264 : vector<8x32xf32>
    %cst_53 = arith.constant 1.000000e+00 : f32
    %266 = vector.broadcast %cst_53 : f32 to vector<8x32xf32>
    %267 = arith.subf %266, %260 : vector<8x32xf32>
    %268 = arith.mulf %267, %265 : vector<8x32xf32>
    %269 = arith.mulf %260, %248 : vector<8x32xf32>
    %270 = arith.addf %268, %269 : vector<8x32xf32>
    %cst_54 = arith.constant 0.000000e+00 : f32
    %271 = vector.broadcast %cst_54 : f32 to vector<8x32xf32>
    %272 = arith.select %89, %270, %271 : vector<8x32xi1>, vector<8x32xf32>
    %273 = arith.select %89, %270, %248 : vector<8x32xi1>, vector<8x32xf32>
    %274 = vector.extract_strided_slice %272 {offsets = [0, 0], sizes = [8, 16], strides = [1, 1]} : vector<8x32xf32> to vector<8x16xf32>
    %275 = vector.extract_strided_slice %272 {offsets = [0, 16], sizes = [8, 16], strides = [1, 1]} : vector<8x32xf32> to vector<8x16xf32>
    %cst_55 = arith.constant dense<0.000000e+00> : vector<8x96xf32>
    %276 = tpu.matmul %273, %16, %cst_55 {dimension_numbers = #tpu.dot_dimension_numbers<[1], [0], [0], [1], [0, 0, 1, 1], [], []>} : vector<8x32xf32>, vector<32x96xf32>, vector<8x96xf32> -> vector<8x96xf32>
    %277 = vector.extract_strided_slice %276 {offsets = [0, 0], sizes = [8, 64], strides = [1, 1]} : vector<8x96xf32> to vector<8x64xf32>
    %278 = arith.addf %91, %277 : vector<8x64xf32>
    %279 = arith.negf %278 : vector<8x64xf32>
    %280 = math.exp %279 : vector<8x64xf32>
    %cst_56 = arith.constant 1.000000e+00 : f32
    %281 = vector.broadcast %cst_56 : f32 to vector<8x64xf32>
    %282 = arith.addf %281, %280 : vector<8x64xf32>
    %283 = arith.divf %281, %282 : vector<8x64xf32>
    %284 = vector.extract_strided_slice %283 {offsets = [0, 0], sizes = [8, 32], strides = [1, 1]} : vector<8x64xf32> to vector<8x32xf32>
    %285 = vector.extract_strided_slice %283 {offsets = [0, 32], sizes = [8, 32], strides = [1, 1]} : vector<8x64xf32> to vector<8x32xf32>
    %286 = vector.extract_strided_slice %276 {offsets = [0, 64], sizes = [8, 32], strides = [1, 1]} : vector<8x96xf32> to vector<8x32xf32>
    %287 = arith.addf %286, %19 : vector<8x32xf32>
    %288 = arith.mulf %284, %287 : vector<8x32xf32>
    %289 = arith.addf %92, %288 : vector<8x32xf32>
    %290 = math.tanh %289 : vector<8x32xf32>
    %cst_57 = arith.constant 1.000000e+00 : f32
    %291 = vector.broadcast %cst_57 : f32 to vector<8x32xf32>
    %292 = arith.subf %291, %285 : vector<8x32xf32>
    %293 = arith.mulf %292, %290 : vector<8x32xf32>
    %294 = arith.mulf %285, %273 : vector<8x32xf32>
    %295 = arith.addf %293, %294 : vector<8x32xf32>
    %cst_58 = arith.constant 0.000000e+00 : f32
    %296 = vector.broadcast %cst_58 : f32 to vector<8x32xf32>
    %297 = arith.select %99, %295, %296 : vector<8x32xi1>, vector<8x32xf32>
    %298 = arith.select %99, %295, %273 : vector<8x32xi1>, vector<8x32xf32>
    %299 = vector.extract_strided_slice %297 {offsets = [0, 0], sizes = [8, 16], strides = [1, 1]} : vector<8x32xf32> to vector<8x16xf32>
    %300 = vector.extract_strided_slice %297 {offsets = [0, 16], sizes = [8, 16], strides = [1, 1]} : vector<8x32xf32> to vector<8x16xf32>
    %301 = tpu.concatenate %124, %300 in 1 : vector<8x16xf32>, vector<8x16xf32> -> vector<8x32xf32>
    %302 = tpu.concatenate %149, %275 in 1 : vector<8x16xf32>, vector<8x16xf32> -> vector<8x32xf32>
    %303 = tpu.concatenate %174, %250 in 1 : vector<8x16xf32>, vector<8x16xf32> -> vector<8x32xf32>
    %304 = tpu.concatenate %199, %225 in 1 : vector<8x16xf32>, vector<8x16xf32> -> vector<8x32xf32>
    %305 = tpu.concatenate %224, %200 in 1 : vector<8x16xf32>, vector<8x16xf32> -> vector<8x32xf32>
    %306 = tpu.concatenate %249, %175 in 1 : vector<8x16xf32>, vector<8x16xf32> -> vector<8x32xf32>
    %307 = tpu.concatenate %274, %150 in 1 : vector<8x16xf32>, vector<8x16xf32> -> vector<8x32xf32>
    %308 = tpu.concatenate %299, %125 in 1 : vector<8x16xf32>, vector<8x16xf32> -> vector<8x32xf32>
    %309 = tpu.concatenate %301, %302, %303, %304, %305, %306, %307, %308 in 1 : vector<8x32xf32>, vector<8x32xf32>, vector<8x32xf32>, vector<8x32xf32>, vector<8x32xf32>, vector<8x32xf32>, vector<8x32xf32>, vector<8x32xf32> -> vector<8x256xf32>
    %c0_59 = arith.constant 0 : index
    %c0_60 = arith.constant 0 : index
    %310 = vector.load %arg8[%c0_59, %c0_60] : memref<8x256xf32, #tpu.memory_space<vmem>>, vector<8x256xf32>
    tpu.vector_store %arg8[%c0_59, %c0_60], %309 {strides = array<i32>} : memref<8x256xf32, #tpu.memory_space<vmem>>, vector<8x256xf32>,
    %c0_61 = arith.constant 0 : index
    %c0_62 = arith.constant 0 : index
    %311 = vector.load %arg6[%c0_61, %c0_62] : memref<32x16xf32, #tpu.memory_space<vmem>>, vector<32x16xf32>
    %cst_63 = arith.constant dense<0.000000e+00> : vector<8x16xf32>
    %312 = tpu.matmul %298, %311, %cst_63 {dimension_numbers = #tpu.dot_dimension_numbers<[1], [0], [0], [1], [0, 0, 1, 1], [], []>} : vector<8x32xf32>, vector<32x16xf32>, vector<8x16xf32> -> vector<8x16xf32>
    %c0_64 = arith.constant 0 : index
    %c0_65 = arith.constant 0 : index
    %313 = vector.load %arg7[%c0_64, %c0_65] : memref<1x16xf32, #tpu.memory_space<vmem>>, vector<1x16xf32>
    %314 = vector.broadcast %313 : vector<1x16xf32> to vector<8x16xf32>
    %315 = arith.addf %312, %314 : vector<8x16xf32>
    %316 = math.tanh %315 : vector<8x16xf32>
    %c0_66 = arith.constant 0 : index
    %c0_67 = arith.constant 0 : index
    %317 = vector.load %arg9[%c0_66, %c0_67] : memref<8x16xf32, #tpu.memory_space<vmem>>, vector<8x16xf32>
    tpu.vector_store %arg9[%c0_66, %c0_67], %316 {strides = array<i32>} : memref<8x16xf32, #tpu.memory_space<vmem>>, vector<8x16xf32>,
    return
  }
}

</mosaic_0001>

<bundles_post_ra>
// kernel: encoder_forward.1
= control target key start
LH: loop header
LB: loop body
LE: loop exit
PB: predicated region body
PF: predicated region fallthrough
CT: control target
= control target key end

     0   :  { %v1598_v0 = vmov 0   ;;  %v1599_v8 = vmov 0.0   ;;  %vm1600_vm0 = vmmov 0   ;;  %v31_v18 = vlaneseq  ;;  %s1602_s16 = smov 96   ;;  %s2062_s0 = inlined_call_operand.vmem [shape: s32[64,1], index: 0, kind: input, shape index: {}]   ;;  %s2063_s1 = inlined_call_operand.vmem [shape: s32[64,1], index: 1, kind: input, shape index: {}]   ;;  %s2064_s4 = inlined_call_operand.vmem [shape: f32[32,96], index: 4, kind: input, shape index: {}]   ;;  %s2065_s3 = inlined_call_operand.vmem [shape: f32[40,96], index: 3, kind: input, shape index: {}]   ;;  %s2066_s5 = inlined_call_operand.vmem [shape: f32[1,32], index: 5, kind: input, shape index: {}]   ;;  %s2067_s2 = inlined_call_operand.vmem [shape: s32[8,1], index: 2, kind: input, shape index: {}]   ;;  %s2068_s6 = inlined_call_operand.vmem [shape: f32[32,16], index: 6, kind: input, shape index: {}]   ;;  %s2069_s8 = inlined_call_operand.vmem [shape: f32[8,256], index: 8, kind: output, shape index: {0}]   ;;  %s2070_s7 = inlined_call_operand.vmem [shape: f32[1,16], index: 7, kind: input, shape index: {}]   ;;  %s2071_s9 = inlined_call_operand.vmem [shape: f32[8,16], index: 9, kind: output, shape index: {1}]  }
   0x1   :  { %1547 = vset.pattern.permute.xlu1 %v1598_v0  ;;  %1546 = vset.pattern.permute.xlu0 %v1598_v0  ;;  %v34_v1 = vld [vmem:[%s2062_s0 + $0x8] sm:$0xff]  ;;  %v33_v2 = vld [vmem:[%s2062_s0] sm:$0xff]  ;;  %v1678_v6 = vld [vmem:[%s2064_s4 + $0x18] sm:$0xff]  ;;  %vm150_vm6 = vcmask 326656   ;;  %v1603_v49 = vmov 7   ;;  %vm311_vm9 = vcmask 261120  }
   0x2   :  { %v74_v3 = vld [vmem:[%s2063_s1 + $0x8] sm:$0xff]  ;;  %45 = vperm.xlu1 %1547, %v34_v1   ;;  %42 = vperm.xlu0 %1546, %v33_v2   ;;  %v73_v5 = vld [vmem:[%s2063_s1] sm:$0xff]  ;;  %v1690_v10 = vld [vmem:[%s2064_s4 + $0x10] sm:$0xff]  ;;  %v1737_v21 = vand.u32 127, %v31_v18 }
   0x3   :  { %v82_v4 = vadd.s32 20, %v74_v3  ;;  %v81_v7 = vadd.s32 20, %v73_v5  ;;  %1434 = vmatprep.subr.mxu1 %v1599_v8  ;;  %1442 = vmatprep.mubr.msk.f32.mxu1 %vm1600_vm0, %v1599_v8  ;;  %v149_v9 = vld [vmem:[%s2065_s3 + $0x20] sm:$0xff]  ;;  %v148_v11 = vld [vmem:[%s2065_s3 + $0x18] sm:$0xff]  ;;  %v1699_v12 = vld [vmem:[%s2064_s4 + $0x8] sm:$0xff] }
   0x4   :  { %1435 = vmatpush3.msra.mxu1 %v1678_v6  ;;  %1412 = vmatprep.subr.mxu0 %v149_v9  ;;  %v147_v13 = vld [vmem:[%s2065_s3 + $0x10] sm:$0xff]  ;;  %v1709_v14 = vld [vmem:[%s2064_s4] sm:$0xff]  ;;  %v146_v15 = vld [vmem:[%s2065_s3 + $0x8] sm:$0xff]  ;;  %s1601_s4 = smov 64   ;;  %vm291_vm8 = vcmp.lt.s32.totalorder %v1737_v21, 16 }
   0x5   :  { %1436 = vmatprep.subr.mxu1 %v1599_v8  ;;  %1413 = vmatpush3.msra.mxu0 %v149_v9  ;;  %v1336_v16 = vld [vmem:[%s2066_s5] ss:$0 sm:$0xff]  ;;  %v292_v50 = vsel %vm291_vm8, 0, %v1603_v49  ;;  %v35_v63 = vld [vmem:[%s2062_s0 + $0x10] sm:$0xff]  ;;  %v36_v1 = vld [vmem:[%s2062_s0 + $0x18] sm:$0xff] }
   0x6   :  { %93 = vperm.xlu1 %1547, %v82_v4   ;;  %90 = vperm.xlu0 %1546, %v81_v7   ;;  %v145_v17 = vld [vmem:[%s2065_s3] sm:$0xff]  ;;  %v76_v18 = vld [vmem:[%s2063_s1 + $0x18] sm:$0xff] }
   0x7   :  { %1437 = vmatpush3.msra.mxu1 %v1690_v10  ;;  %1414 = vmatprep.subr.mxu0 %v148_v11  ;;  %v280_v39 = vld [vmem:[%s2067_s2] sm:$0xff]  ;;  %s1604_s2 = smov 32  }
   0x8   :  { %1438 = vmatprep.subr.mxu1 %v1599_v8  ;;  %1415 = vmatpush3.msra.mxu0 %v148_v11 }
   0x9   :  { %1439 = vmatpush3.msra.mxu1 %v1699_v12  ;;  %1416 = vmatprep.subr.mxu0 %v147_v13 }
   0xa   :  { %1440 = vmatprep.subr.mxu1 %v1599_v8  ;;  %1417 = vmatpush3.msra.mxu0 %v147_v13 }
   0xb   :  { %1441 = vmatpush3.msra.mxu1 %v1709_v14  ;;  %1418 = vmatprep.subr.mxu0 %v146_v15 }
   0xc   :  { %1443 = vmatmul.mubr.f32.vlgmr.msra.gmra.mxu1 %v1599_v8  ;;  %1419 = vmatpush3.msra.mxu0 %v146_v15  ;;  %v75_v15 = vld [vmem:[%s2063_s1 + $0x10] sm:$0xff] }
   0xd   :  { %392 = vrot.lane.b32.xlu0 %v1336_v16, %s1601_s4  ;;  %1420 = vmatprep.subr.mxu0 %v145_v17 }
   0xe   :  { %1421 = vmatpush3.msra.mxu0 %v145_v17  ;;  %1445 = vmatprep.subr.mxu1 %v1599_v8  ;;  %v83_v17 = vadd.s32 20, %v75_v15 }
   0xf   :  { %1446 = vmatpush3.msra.mxu1 %v1678_v6  ;;  %1453 = vmatprep.mubr.msk.f32.mxu1 %vm1600_vm0, %v1599_v8 }
  0x10   :  { %1447 = vmatprep.subr.mxu1 %v1599_v8  ;;  %1467 = vmatprep.subr.mxu0 %v1599_v8 }
  0x11   :  { %1448 = vmatpush3.msra.mxu1 %v1690_v10 }
  0x12   :  { %1449 = vmatprep.subr.mxu1 %v1599_v8 }
  0x13   :  { %1450 = vmatpush3.msra.mxu1 %v1699_v12 }
  0x14   :  { %1451 = vmatprep.subr.mxu1 %v1599_v8 }
  0x15   :  { %1452 = vmatpush3.msra.mxu1 %v1709_v14 }
  0x16   :  { %1456 = vmatprep.subr.mxu1 %v1599_v8 }
  0x7d   :  { %v46_v19 = vpop.permute.xlu1 %45  ;;  %v43_v20 = vpop.permute.xlu0 %42 }
  0x7e   :  { %vm66_vm1 = vcmp.eq.s32.totalorder %v46_v19, %v1737_v21  ;;  %vm65_vm4 = vcmp.eq.s32.totalorder %v43_v20, %v1737_v21  ;;  %v84_v19 = vadd.s32 20, %v76_v18  ;;  %v1605_v20 = vmov 6  }
  0x81   :  { %v94_v22 = vpop.permute.xlu1 %93  ;;  %v91_v23 = vpop.permute.xlu0 %90 }
  0x82   :  { %vm114_vm2 = vcmp.eq.s32.totalorder %v94_v22, %v1737_v21  ;;  %vm113_vm3 = vcmp.eq.s32.totalorder %v91_v23, %v1737_v21  ;;  %v297_v22 = vsel %vm291_vm8, 1, %v1605_v20 }
  0x83   :  { %vm122_vm5 = vmor %vm66_vm1, %vm114_vm2 }
  0x84   :  { %v1321_v24 = vsel %vm122_vm5, 1.0, %v1599_v8  ;;  %vm121_vm7 = vmor %vm65_vm4, %vm113_vm3 }
  0x85   :  { %v1320_v25 = vsel %vm121_vm7, 1.0, %v1599_v8  ;;  %v1755_v26 = vpop.permute.xlu0 %392 }
  0x86   :  { %1422 = vmatprep.mubr.msk.f32.mxu0 %vm150_vm6, %v1320_v25 }
  0x87   :  { %1423 = vmatmul.mubr.msk.f32.vlgmr.msra.gmra.mxu0 %vm150_vm6, %v1321_v24 }
  0x88   :  { %1468 = vmatpush3.msra.mxu0 %v1678_v6 }
  0x89   :  { %1469 = vmatprep.subr.mxu0 %v1599_v8 }
  0x8a   :  { %1470 = vmatpush3.msra.mxu0 %v1690_v10 }
  0x8b   :  { %1471 = vmatprep.subr.mxu0 %v1599_v8 }
  0x8c   :  { %1472 = vmatpush3.msra.mxu0 %v1699_v12 }
  0x8d   :  { %1473 = vmatprep.subr.mxu0 %v1599_v8 }
  0x8e   :  { %1474 = vmatpush3.msra.mxu0 %v1709_v14 }
  0x8f   :  { %1489 = vmatprep.subr.mxu0 %v1599_v8 }
  0xcc   :  { %v381_v27 = vpop.f32.mrf.mxu1 }
  0xcd   :  { %v395_v28 = vadd.f32 %v1755_v26, %v381_v27 }
  0xce   :  { %v1444_v29 = vpop.f32.mrf.mxu1 }
  0xcf   :  { %397 = vrot.lane.b32.xlu1 %v395_v28, %s1601_s4 }
 0x141   :  { %v398_v36 = vpop.permute.xlu1 %397 }
 0x147   :  { %v1759_v30 = vpop.f32.mrf.mxu0 }
 0x149   :  { %v241_v31 = vpop.f32.mrf.mxu0 }
 0x14a   :  { %v385_v32 = vadd.f32 %v381_v27, %v241_v31 }
 0x14c   :  { %v1337_v33 = vmul.f32 -1.442695, %v385_v32 }
 0x14e   :  { %1548 = vpow2.f32 %v1337_v33 }
 0x15b   :  { %v1549_v34 = vpop.eup %1548 }
 0x15c   :  { %v389_v35 = vadd.f32 1.0, %v1549_v34 }
 0x15e   :  { %1550 = vrcp.f32 %v389_v35 }
 0x16b   :  { %v1551_v37 = vpop.eup %1550 }
 0x16c   :  { %v400_v38 = vmul.f32 %v1551_v37, %v398_v36  ;;  %v407_v43 = vsub.f32 1.0, %v1551_v37  ;;  %v413_v45 = vmul.f32 0.0, %v1551_v37 }
 0x16e   :  { %402 = vrot.lane.b32.xlu0 %v400_v38, %s1601_s4 }
 0x172   :  { %294 = vperm.xlu0 %1546, %v280_v39  }
 0x1e0   :  { %v403_v40 = vpop.permute.xlu0 %402 }
 0x1e1   :  { %v405_v41 = vadd.f32 %v403_v40, %v241_v31 }
 0x1e3   :  { %1552 = vtanh.f32 %v405_v41 }
 0x1ed   :  { %v1768_v48 = vpop.permute.xlu0 %294 }
 0x1ee   :  { %vm296_vm10 = vcmp.gt.s32.totalorder %v1768_v48, %v292_v50  ;;  %vm298_vm11 = vcmp.gt.s32.totalorder %v1768_v48, %v297_v22  ;;  %v79_v50 = vld [vmem:[%s2063_s1 + $0x30] sm:$0xff] }
 0x1f0   :  { %v1553_v42 = vpop.eup %1552 }
 0x1f1   :  { %409 = vrot.lane.b32.xlu1 %v1553_v42, %s1602_s16 }
 0x263   :  { %v410_v44 = vpop.permute.xlu1 %409 }
 0x264   :  { %v412_v46 = vmul.f32 %v410_v44, %v407_v43 }
 0x266   :  { %v414_v47 = vadd.f32 %v413_v45, %v412_v46  ;;  %v77_v45 = vld [vmem:[%s2063_s1 + $0x20] sm:$0xff] }
 0x267   :  { %v85_v46 = vadd.s32 20, %v77_v45 }
 0x268   :  { %416 = vrot.lane.b32.xlu1 %v414_v47, %s1602_s16  ;;  %v78_v47 = vld [vmem:[%s2063_s1 + $0x28] sm:$0xff] }
 0x269   :  { %v86_v49 = vadd.s32 20, %v78_v47 }
 0x2da   :  { %v417_v51 = vpop.permute.xlu1 %416 }
 0x2db   :  { %v1773_v52 = vsel %vm296_vm10, %v417_v51, 0.0  ;;  %v87_v51 = vadd.s32 20, %v79_v50 }
 0x2dc   :  { %1454 = vmatmul.mubr.msk.f32.vlgmr.msra.gmra.mxu1 %vm311_vm9, %v1773_v52 }
 0x2dd   :  { %1457 = vmatpush3.msra.mxu1 %v1678_v6  ;;  %1464 = vmatprep.mubr.msk.f32.mxu1 %vm1600_vm0, %v1599_v8 }
 0x2de   :  { %1458 = vmatprep.subr.mxu1 %v1599_v8 }
 0x2df   :  { %1459 = vmatpush3.msra.mxu1 %v1690_v10 }
 0x2e0   :  { %1460 = vmatprep.subr.mxu1 %v1599_v8 }
 0x2e1   :  { %1461 = vmatpush3.msra.mxu1 %v1699_v12 }
 0x2e2   :  { %1462 = vmatprep.subr.mxu1 %v1599_v8 }
 0x2e3   :  { %1463 = vmatpush3.msra.mxu1 %v1709_v14 }
 0x2e4   :  { %1478 = vmatprep.subr.mxu1 %v1599_v8 }
 0x39c   :  { %v489_v53 = vpop.f32.mrf.mxu1 }
 0x39d   :  { %v500_v54 = vadd.f32 %v489_v53, %v1755_v26  ;;  %v493_v56 = vadd.f32 %v1759_v30, %v489_v53  ;;  %v80_v53 = vld [vmem:[%s2063_s1 + $0x38] sm:$0xff] }
 0x39e   :  { %v1455_v55 = vpop.f32.mrf.mxu1 }
 0x39f   :  { %502 = vrot.lane.b32.xlu0 %v500_v54, %s1601_s4  ;;  %v1339_v57 = vmul.f32 -1.442695, %v493_v56  ;;  %v88_v54 = vadd.s32 20, %v80_v53 }
 0x3a1   :  { %1554 = vpow2.f32 %v1339_v57 }
 0x3ae   :  { %v1555_v58 = vpop.eup %1554 }
 0x3af   :  { %v497_v59 = vadd.f32 1.0, %v1555_v58  ;;  %v37_v58 = vld [vmem:[%s2062_s0 + $0x20] sm:$0xff] }
 0x3b1   :  { %1556 = vrcp.f32 %v497_v59  ;;  %v38_v59 = vld [vmem:[%s2062_s0 + $0x28] sm:$0xff] }
 0x3be   :  { %v1557_v60 = vpop.eup %1556 }
 0x3bf   :  { %v512_v7 = vsub.f32 1.0, %v1557_v60 }
 0x411   :  { %v503_v61 = vpop.permute.xlu0 %502 }
 0x412   :  { %v505_v62 = vmul.f32 %v1557_v60, %v503_v61  ;;  %v40_v61 = vld [vmem:[%s2062_s0 + $0x38] sm:$0xff] }
 0x414   :  { %507 = vrot.lane.b32.xlu1 %v505_v62, %s1601_s4 }
 0x418   :  { %518 = vrot.lane.b32.xlu1 %v1773_v52, %s1604_s2 }
 0x41c   :  { %48 = vperm.xlu1 %1547, %v35_v63  }
 0x420   :  { %51 = vperm.xlu1 %1547, %v36_v1  }
 0x486   :  { %v508_v2 = vpop.permute.xlu1 %507 }
 0x487   :  { %v510_v3 = vadd.f32 %v1759_v30, %v508_v2 }
 0x489   :  { %1558 = vtanh.f32 %v510_v3 }
 0x48a   :  { %v519_v5 = vpop.permute.xlu1 %518 }
 0x48b   :  { %v521_v11 = vmul.f32 %v1557_v60, %v519_v5  ;;  %v39_v60 = vld [vmem:[%s2062_s0 + $0x30] sm:$0xff] }
 0x496   :  { %v1559_v4 = vpop.eup %1558 }
 0x497   :  { %514 = vrot.lane.b32.xlu0 %v1559_v4, %s1602_s16  ;;  %v49_v27 = vpop.permute.xlu1 %48 }
 0x498   :  { %vm67_vm12 = vcmp.eq.s32.totalorder %v49_v27, %v1737_v21 }
 0x49b   :  { %v52_v29 = vpop.permute.xlu1 %51 }
 0x49c   :  { %vm68_vm15 = vcmp.eq.s32.totalorder %v52_v29, %v1737_v21 }
 0x509   :  { %v515_v9 = vpop.permute.xlu0 %514 }
 0x50a   :  { %v517_v13 = vmul.f32 %v515_v9, %v512_v7 }
 0x50c   :  { %v522_v16 = vadd.f32 %v521_v11, %v517_v13 }
 0x50e   :  { %524 = vrot.lane.b32.xlu0 %v522_v16, %s1602_s16 }
 0x512   :  { %96 = vperm.xlu0 %1546, %v83_v17  }
 0x516   :  { %99 = vperm.xlu0 %1546, %v84_v19  }
 0x580   :  { %v525_v23 = vpop.permute.xlu0 %524 }
 0x581   :  { %v1811_v24 = vsel %vm298_vm11, %v525_v23, 0.0  ;;  %v1814_v25 = vsel %vm298_vm11, %v525_v23, %v1773_v52  ;;  %v1606_v23 = vmov 5  }
 0x582   :  { %1465 = vmatmul.mubr.msk.f32.vlgmr.msra.gmra.mxu1 %vm311_vm9, %v1814_v25  ;;  %v1889_v27 = vsel %vm291_vm8, 2, %v1606_v23 }
 0x583   :  { %1479 = vmatpush3.msra.mxu1 %v1678_v6  ;;  %1486 = vmatprep.mubr.msk.f32.mxu1 %vm1600_vm0, %v1599_v8 }
 0x584   :  { %1480 = vmatprep.subr.mxu1 %v1599_v8 }
 0x585   :  { %1481 = vmatpush3.msra.mxu1 %v1690_v10 }
 0x586   :  { %1482 = vmatprep.subr.mxu1 %v1599_v8 }
 0x587   :  { %1483 = vmatpush3.msra.mxu1 %v1699_v12 }
 0x588   :  { %1484 = vmatprep.subr.mxu1 %v1599_v8 }
 0x589   :  { %1485 = vmatpush3.msra.mxu1 %v1709_v14 }
 0x58a   :  { %1500 = vmatprep.subr.mxu1 %v1599_v8 }
 0x58d   :  { %v97_v28 = vpop.permute.xlu0 %96 }
 0x58e   :  { %vm115_vm13 = vcmp.eq.s32.totalorder %v97_v28, %v1737_v21 }
 0x58f   :  { %vm123_vm14 = vmor %vm67_vm12, %vm115_vm13 }
 0x590   :  { %v1322_v30 = vsel %vm123_vm14, 1.0, %v1599_v8 }
 0x591   :  { %v100_v31 = vpop.permute.xlu0 %99  ;;  %1425 = vmatprep.mubr.msk.f32.mxu0 %vm150_vm6, %v1322_v30 }
 0x592   :  { %vm116_vm1 = vcmp.eq.s32.totalorder %v100_v31, %v1737_v21 }
 0x593   :  { %vm124_vm2 = vmor %vm68_vm15, %vm116_vm1 }
 0x594   :  { %v1323_v32 = vsel %vm124_vm2, 1.0, %v1599_v8 }
 0x595   :  { %1426 = vmatmul.mubr.msk.f32.gmra.mxu0 %vm150_vm6, %v1323_v32 }
 0x642   :  { %v598_v33 = vpop.f32.mrf.mxu1 }
 0x643   :  { %v609_v34 = vadd.f32 %v598_v33, %v1755_v26 }
 0x644   :  { %v1466_v35 = vpop.f32.mrf.mxu1 }
 0x645   :  { %611 = vrot.lane.b32.xlu1 %v609_v34, %s1601_s4 }
 0x655   :  { %v1838_v36 = vpop.f32.mrf.mxu0 }
 0x657   :  { %v251_v37 = vpop.f32.mrf.mxu0 }
 0x658   :  { %v602_v38 = vadd.f32 %v598_v33, %v251_v37 }
 0x65a   :  { %v1341_v39 = vmul.f32 -1.442695, %v602_v38 }
 0x65c   :  { %1560 = vpow2.f32 %v1341_v39 }
 0x669   :  { %v1561_v40 = vpop.eup %1560 }
 0x66a   :  { %v606_v41 = vadd.f32 1.0, %v1561_v40 }
 0x66c   :  { %1562 = vrcp.f32 %v606_v41 }
 0x679   :  { %v1563_v42 = vpop.eup %1562 }
 0x67a   :  { %v621_v63 = vsub.f32 1.0, %v1563_v42 }
 0x6b7   :  { %v612_v43 = vpop.permute.xlu1 %611 }
 0x6b8   :  { %v614_v44 = vmul.f32 %v1563_v42, %v612_v43 }
 0x6ba   :  { %616 = vrot.lane.b32.xlu0 %v614_v44, %s1601_s4 }
 0x6be   :  { %627 = vrot.lane.b32.xlu0 %v1814_v25, %s1604_s2 }
 0x6c2   :  { %102 = vperm.xlu0 %1546, %v85_v46  }
 0x6c6   :  { %105 = vperm.xlu0 %1546, %v86_v49  }
 0x6ca   :  { %108 = vperm.xlu0 %1546, %v87_v51  }
 0x6ce   :  { %111 = vperm.xlu0 %1546, %v88_v54  }
 0x72c   :  { %v617_v55 = vpop.permute.xlu0 %616 }
 0x72d   :  { %v619_v56 = vadd.f32 %v617_v55, %v251_v37  ;;  %v1607_v55 = vmov 4  }
 0x72f   :  { %1564 = vtanh.f32 %v619_v56  ;;  %v301_v56 = vsel %vm291_vm8, 3, %v1607_v55 }
 0x730   :  { %v628_v62 = vpop.permute.xlu0 %627 }
 0x731   :  { %v630_v2 = vmul.f32 %v1563_v42, %v628_v62 }
 0x73c   :  { %v1565_v57 = vpop.eup %1564 }
 0x73d   :  { %623 = vrot.lane.b32.xlu1 %v1565_v57, %s1602_s16  ;;  %v103_v5 = vpop.permute.xlu0 %102 }
 0x73e   :  { %vm117_vm3 = vcmp.eq.s32.totalorder %v103_v5, %v1737_v21 }
 0x741   :  { %54 = vperm.xlu1 %1547, %v37_v58   ;;  %v106_v7 = vpop.permute.xlu0 %105 }
 0x742   :  { %vm118_vm7 = vcmp.eq.s32.totalorder %v106_v7, %v1737_v21 }
 0x745   :  { %57 = vperm.xlu1 %1547, %v38_v59   ;;  %v109_v13 = vpop.permute.xlu0 %108 }
 0x746   :  { %vm119_vm12 = vcmp.eq.s32.totalorder %v109_v13, %v1737_v21 }
 0x749   :  { %60 = vperm.xlu1 %1547, %v39_v60   ;;  %v112_v18 = vpop.permute.xlu0 %111 }
 0x74a   :  { %vm120_vm15 = vcmp.eq.s32.totalorder %v112_v18, %v1737_v21 }
 0x74d   :  { %63 = vperm.xlu1 %1547, %v40_v61  }
 0x7af   :  { %v624_v1 = vpop.permute.xlu1 %623 }
 0x7b0   :  { %v626_v3 = vmul.f32 %v624_v1, %v621_v63 }
 0x7b2   :  { %v631_v4 = vadd.f32 %v630_v2, %v626_v3 }
 0x7b4   :  { %633 = vrot.lane.b32.xlu1 %v631_v4, %s1602_s16 }
 0x7bc   :  { %v55_v9 = vpop.permute.xlu1 %54 }
 0x7bd   :  { %vm69_vm4 = vcmp.eq.s32.totalorder %v55_v9, %v1737_v21 }
 0x7be   :  { %vm125_vm5 = vmor %vm69_vm4, %vm117_vm3  ;;  %vm300_vm3 = vcmp.gt.s32.totalorder %v1768_v48, %v1889_v27  ;;  %vm1183_vm4 = vcmask 130048  }
 0x7bf   :  { %v1324_v11 = vsel %vm125_vm5, 1.0, %v1599_v8 }
 0x7c0   :  { %v58_v15 = vpop.permute.xlu1 %57  ;;  %1428 = vmatprep.mubr.msk.f32.mxu0 %vm150_vm6, %v1324_v11 }
 0x7c1   :  { %vm70_vm10 = vcmp.eq.s32.totalorder %v58_v15, %v1737_v21 }
 0x7c2   :  { %vm126_vm11 = vmor %vm70_vm10, %vm118_vm7 }
 0x7c3   :  { %v1325_v16 = vsel %vm126_vm11, 1.0, %v1599_v8  ;;  %vm1217_vm11 = vcmask 523264  }
 0x7c4   :  { %v61_v17 = vpop.permute.xlu1 %60  ;;  %1429 = vmatmul.mubr.msk.f32.gmra.mxu0 %vm150_vm6, %v1325_v16 }
 0x7c5   :  { %vm71_vm13 = vcmp.eq.s32.totalorder %v61_v17, %v1737_v21 }
 0x7c6   :  { %vm127_vm14 = vmor %vm71_vm13, %vm119_vm12  ;;  %vm1219_vm12 = vcmask 785408  }
 0x7c7   :  { %v1326_v19 = vsel %vm127_vm14, 1.0, %v1599_v8 }
 0x7c8   :  { %v64_v20 = vpop.permute.xlu1 %63  ;;  %1431 = vmatprep.mubr.msk.f32.mxu0 %vm150_vm6, %v1326_v19  ;;  %v1608_v19 = vmov 3  }
 0x7c9   :  { %vm72_vm1 = vcmp.eq.s32.totalorder %v64_v20, %v1737_v21  ;;  %v303_v20 = vsel %vm291_vm8, 4, %v1608_v19 }
 0x7ca   :  { %vm128_vm2 = vmor %vm72_vm1, %vm120_vm15  ;;  %vm304_vm5 = vcmp.gt.s32.totalorder %v1768_v48, %v303_v20 }
 0x7cb   :  { %v1327_v22 = vsel %vm128_vm2, 1.0, %v1599_v8 }
 0x7cc   :  { %1432 = vmatmul.mubr.msk.f32.gmra.mxu0 %vm150_vm6, %v1327_v22  ;;  %vm302_vm6 = vcmp.gt.s32.totalorder %v1768_v48, %v301_v56 }
 0x7cd   :  { %1475 = vmatprep.mubr.msk.f32.mxu0 %vm1600_vm0, %v1599_v8 }
 0x826   :  { %v1893_v28 = vpop.permute.xlu1 %633 }
 0x827   :  { %v637_v29 = vsel %vm300_vm3, %v1893_v28, %v1814_v25 }
 0x828   :  { %1476 = vmatmul.mubr.msk.f32.vlgmr.msra.gmra.mxu0 %vm311_vm9, %v637_v29 }
 0x829   :  { %1490 = vmatpush3.msra.mxu0 %v1678_v6  ;;  %1497 = vmatprep.mubr.msk.f32.mxu0 %vm1600_vm0, %v1599_v8 }
 0x82a   :  { %1491 = vmatprep.subr.mxu0 %v1599_v8 }
 0x82b   :  { %1492 = vmatpush3.msra.mxu0 %v1690_v10 }
 0x82c   :  { %1493 = vmatprep.subr.mxu0 %v1599_v8 }
 0x82d   :  { %1494 = vmatpush3.msra.mxu0 %v1699_v12 }
 0x82e   :  { %1495 = vmatprep.subr.mxu0 %v1599_v8 }
 0x82f   :  { %1496 = vmatpush3.msra.mxu0 %v1709_v14 }
 0x830   :  { %1511 = vmatprep.subr.mxu0 %v1599_v8 }
 0x884   :  { %v1911_v25 = vpop.f32.mrf.mxu0 }
 0x886   :  { %v261_v30 = vpop.f32.mrf.mxu0 }
 0x88c   :  { %v1913_v31 = vpop.f32.mrf.mxu0 }
 0x88e   :  { %v1915_v32 = vpop.f32.mrf.mxu0 }
 0x8e8   :  { %v707_v33 = vpop.f32.mrf.mxu0 }
 0x8e9   :  { %v718_v34 = vadd.f32 %v707_v33, %v1755_v26  ;;  %v711_v37 = vadd.f32 %v1838_v36, %v707_v33 }
 0x8ea   :  { %v1477_v35 = vpop.f32.mrf.mxu0 }
 0x8eb   :  { %720 = vrot.lane.b32.xlu0 %v718_v34, %s1601_s4  ;;  %v1343_v38 = vmul.f32 -1.442695, %v711_v37 }
 0x8ed   :  { %1566 = vpow2.f32 %v1343_v38 }
 0x8fa   :  { %v1567_v39 = vpop.eup %1566 }
 0x8fb   :  { %v715_v40 = vadd.f32 1.0, %v1567_v39 }
 0x8fd   :  { %1568 = vrcp.f32 %v715_v40 }
 0x90a   :  { %v1569_v41 = vpop.eup %1568 }
 0x90b   :  { %v730_v49 = vsub.f32 1.0, %v1569_v41 }
 0x95d   :  { %v721_v42 = vpop.permute.xlu0 %720 }
 0x95e   :  { %v723_v43 = vmul.f32 %v1569_v41, %v721_v42 }
 0x960   :  { %725 = vrot.lane.b32.xlu1 %v723_v43, %s1601_s4 }
 0x964   :  { %736 = vrot.lane.b32.xlu1 %v637_v29, %s1604_s2 }
 0x9d2   :  { %v726_v44 = vpop.permute.xlu1 %725 }
 0x9d3   :  { %v728_v45 = vadd.f32 %v1838_v36, %v726_v44 }
 0x9d5   :  { %1570 = vtanh.f32 %v728_v45 }
 0x9d6   :  { %v737_v47 = vpop.permute.xlu1 %736 }
 0x9d7   :  { %v739_v51 = vmul.f32 %v1569_v41, %v737_v47 }
 0x9e2   :  { %v1571_v46 = vpop.eup %1570 }
 0x9e3   :  { %732 = vrot.lane.b32.xlu0 %v1571_v46, %s1602_s16 }
 0xa55   :  { %v733_v50 = vpop.permute.xlu0 %732 }
 0xa56   :  { %v735_v53 = vmul.f32 %v733_v50, %v730_v49 }
 0xa58   :  { %v740_v54 = vadd.f32 %v739_v51, %v735_v53  ;;  %v1609_v53 = vmov 2  }
 0xa5a   :  { %742 = vrot.lane.b32.xlu0 %v740_v54, %s1602_s16  ;;  %v305_v54 = vsel %vm291_vm8, 5, %v1609_v53 }
 0xa5b   :  { %vm306_vm7 = vcmp.gt.s32.totalorder %v1768_v48, %v305_v54 }
 0xacc   :  { %v743_v57 = vpop.permute.xlu0 %742 }
 0xacd   :  { %v746_v36 = vsel %vm302_vm6, %v743_v57, %v637_v29  ;;  %v745_v23 = vsel %vm302_vm6, %v743_v57, 0.0 }
 0xace   :  { %1487 = vmatmul.mubr.msk.f32.vlgmr.msra.gmra.mxu1 %vm311_vm9, %v746_v36 }
 0xacf   :  { %1501 = vmatpush3.msra.mxu1 %v1678_v6  ;;  %1508 = vmatprep.mubr.msk.f32.mxu1 %vm1600_vm0, %v1599_v8 }
 0xad0   :  { %1502 = vmatprep.subr.mxu1 %v1599_v8 }
 0xad1   :  { %1503 = vmatpush3.msra.mxu1 %v1690_v10 }
 0xad2   :  { %1504 = vmatprep.subr.mxu1 %v1599_v8 }
 0xad3   :  { %1505 = vmatpush3.msra.mxu1 %v1699_v12 }
 0xad4   :  { %1506 = vmatprep.subr.mxu1 %v1599_v8 }
 0xad5   :  { %1507 = vmatpush3.msra.mxu1 %v1709_v14 }
 0xad6   :  { %1522 = vmatprep.subr.mxu1 %v1599_v8 }
 0xb8e   :  { %v816_v58 = vpop.f32.mrf.mxu1 }
 0xb8f   :  { %v827_v59 = vadd.f32 %v816_v58, %v1755_v26  ;;  %v820_v61 = vadd.f32 %v816_v58, %v261_v30 }
 0xb90   :  { %v1488_v60 = vpop.f32.mrf.mxu1 }
 0xb91   :  { %829 = vrot.lane.b32.xlu1 %v827_v59, %s1601_s4  ;;  %v1345_v62 = vmul.f32 -1.442695, %v820_v61 }
 0xb93   :  { %1572 = vpow2.f32 %v1345_v62 }
 0xba0   :  { %v1573_v63 = vpop.eup %1572 }
 0xba1   :  { %v824_v1 = vadd.f32 1.0, %v1573_v63 }
 0xba3   :  { %1574 = vrcp.f32 %v824_v1 }
 0xbb0   :  { %v1575_v2 = vpop.eup %1574 }
 0xbb1   :  { %v839_v13 = vsub.f32 1.0, %v1575_v2 }
 0xc03   :  { %v830_v3 = vpop.permute.xlu1 %829 }
 0xc04   :  { %v832_v4 = vmul.f32 %v1575_v2, %v830_v3 }
 0xc06   :  { %834 = vrot.lane.b32.xlu0 %v832_v4, %s1601_s4 }
 0xc0a   :  { %845 = vrot.lane.b32.xlu0 %v746_v36, %s1604_s2 }
 0xc78   :  { %v835_v5 = vpop.permute.xlu0 %834 }
 0xc79   :  { %v837_v7 = vadd.f32 %v835_v5, %v261_v30 }
 0xc7b   :  { %1576 = vtanh.f32 %v837_v7 }
 0xc7c   :  { %v846_v11 = vpop.permute.xlu0 %845 }
 0xc7d   :  { %v848_v16 = vmul.f32 %v1575_v2, %v846_v11 }
 0xc88   :  { %v1577_v9 = vpop.eup %1576 }
 0xc89   :  { %841 = vrot.lane.b32.xlu1 %v1577_v9, %s1602_s16 }
 0xcfb   :  { %v842_v15 = vpop.permute.xlu1 %841 }
 0xcfc   :  { %v844_v17 = vmul.f32 %v842_v15, %v839_v13 }
 0xcfe   :  { %v849_v18 = vadd.f32 %v848_v16, %v844_v17 }
 0xd00   :  { %851 = vrot.lane.b32.xlu1 %v849_v18, %s1602_s16  ;;  %v1610_v18 = vmov 1  }
 0xd01   :  { %v307_v19 = vsel %vm291_vm8, 6, %v1610_v18 }
 0xd72   :  { %v852_v22 = vpop.permute.xlu1 %851 }
 0xd73   :  { %v854_v29 = vsel %vm304_vm5, %v852_v22, 0.0  ;;  %v855_v30 = vsel %vm304_vm5, %v852_v22, %v746_v36 }
 0xd74   :  { %1498 = vmatmul.mubr.msk.f32.vlgmr.msra.gmra.mxu0 %vm311_vm9, %v855_v30  ;;  %v1954_v33 = vsel %vm1183_vm4, %v745_v23, %v854_v29  ;;  %v1957_v34 = vsel %vm1183_vm4, %v854_v29, %v745_v23 }
 0xd75   :  { %1512 = vmatpush3.msra.mxu0 %v1678_v6  ;;  %1519 = vmatprep.mubr.msk.f32.mxu0 %vm1600_vm0, %v1599_v8 }
 0xd76   :  { %1513 = vmatprep.subr.mxu0 %v1599_v8 }
 0xd77   :  { %1514 = vmatpush3.msra.mxu0 %v1690_v10 }
 0xd78   :  { %1515 = vmatprep.subr.mxu0 %v1599_v8 }
 0xd79   :  { %1516 = vmatpush3.msra.mxu0 %v1699_v12 }
 0xd7a   :  { %1517 = vmatprep.subr.mxu0 %v1599_v8 }
 0xd7b   :  { %1518 = vmatpush3.msra.mxu0 %v1709_v14 }
 0xe34   :  { %v925_v35 = vpop.f32.mrf.mxu0 }
 0xe35   :  { %v936_v37 = vadd.f32 %v925_v35, %v1755_v26  ;;  %v929_v6 = vadd.f32 %v1911_v25, %v925_v35 }
 0xe36   :  { %v1499_v38 = vpop.f32.mrf.mxu0 }
 0xe37   :  { %938 = vrot.lane.b32.xlu0 %v936_v37, %s1601_s4  ;;  %v1347_v39 = vmul.f32 -1.442695, %v929_v6 }
 0xe39   :  { %1578 = vpow2.f32 %v1347_v39 }
 0xe46   :  { %v1579_v40 = vpop.eup %1578 }
 0xe47   :  { %v933_v10 = vadd.f32 1.0, %v1579_v40 }
 0xe49   :  { %1580 = vrcp.f32 %v933_v10 }
 0xe56   :  { %v1581_v41 = vpop.eup %1580 }
 0xe57   :  { %v948_v46 = vsub.f32 1.0, %v1581_v41 }
 0xea9   :  { %v939_v42 = vpop.permute.xlu0 %938 }
 0xeaa   :  { %v941_v12 = vmul.f32 %v1581_v41, %v939_v42 }
 0xeac   :  { %943 = vrot.lane.b32.xlu1 %v941_v12, %s1601_s4 }
 0xeb0   :  { %954 = vrot.lane.b32.xlu1 %v855_v30, %s1604_s2 }
 0xf1e   :  { %v944_v14 = vpop.permute.xlu1 %943 }
 0xf1f   :  { %v946_v43 = vadd.f32 %v1911_v25, %v944_v14  ;;  %v636_v25 = vsel %vm300_vm3, %v1893_v28, 0.0  ;;  %v1229_v14 = vld [vmem:[%s2068_s6 + $0x18] sm:$0xff] }
 0xf21   :  { %1582 = vtanh.f32 %v946_v43  ;;  %v1228_v43 = vld [vmem:[%s2068_s6 + $0x10] sm:$0xff] }
 0xf22   :  { %v955_v45 = vpop.permute.xlu1 %954 }
 0xf23   :  { %v957_v49 = vmul.f32 %v1581_v41, %v955_v45 }
 0xf2e   :  { %v1583_v44 = vpop.eup %1582 }
 0xf2f   :  { %950 = vrot.lane.b32.xlu0 %v1583_v44, %s1602_s16 }
 0xfa1   :  { %v951_v47 = vpop.permute.xlu0 %950 }
 0xfa2   :  { %v953_v50 = vmul.f32 %v951_v47, %v948_v46 }
 0xfa4   :  { %v958_v51 = vadd.f32 %v957_v49, %v953_v50 }
 0xfa6   :  { %960 = vrot.lane.b32.xlu0 %v958_v51, %s1602_s16 }
0x1018   :  { %v961_v55 = vpop.permute.xlu0 %960 }
0x1019   :  { %v963_v56 = vsel %vm306_vm7, %v961_v55, 0.0  ;;  %v964_v57 = vsel %vm306_vm7, %v961_v55, %v855_v30 }
0x101a   :  { %1509 = vmatmul.mubr.msk.f32.vlgmr.msra.gmra.mxu1 %vm311_vm9, %v964_v57  ;;  %v1186_v36 = vsel %vm1183_vm4, %v636_v25, %v963_v56  ;;  %v1986_v58 = vsel %vm1183_vm4, %v963_v56, %v636_v25 }
0x101b   :  { %1530 = vmatprep.mubr.msk.f32.mxu1 %vm1600_vm0, %v1599_v8  ;;  %vm308_vm0 = vcmp.gt.s32.totalorder %v1768_v48, %v307_v19  ;;  %1523 = vmatpush3.msra.mxu1 %v1229_v14 }
0x101c   :  { %1524 = vmatprep.subr.mxu1 %v1599_v8 }
0x101d   :  { %1525 = vmatpush3.msra.mxu1 %v1228_v43 }
0x101e   :  { %1526 = vmatprep.subr.mxu1 %v1599_v8 }
0x10da   :  { %v1034_v59 = vpop.f32.mrf.mxu1 }
0x10db   :  { %v1045_v60 = vadd.f32 %v1034_v59, %v1755_v26  ;;  %v1038_v27 = vadd.f32 %v1034_v59, %v1915_v32 }
0x10dc   :  { %v1510_v61 = vpop.f32.mrf.mxu1 }
0x10dd   :  { %1047 = vrot.lane.b32.xlu1 %v1045_v60, %s1601_s4  ;;  %v1349_v28 = vmul.f32 -1.442695, %v1038_v27 }
0x10df   :  { %1584 = vpow2.f32 %v1349_v28  ;;  %v1352_v28 = vld [vmem:[%s2070_s7] ss:$0 sm:$0xff] }
0x10ec   :  { %v1585_v62 = vpop.eup %1584 }
0x10ed   :  { %v1042_v63 = vadd.f32 1.0, %v1585_v62 }
0x10ef   :  { %1586 = vrcp.f32 %v1042_v63 }
0x10fc   :  { %v1587_v1 = vpop.eup %1586 }
0x10fd   :  { %v1057_v11 = vsub.f32 1.0, %v1587_v1 }
0x114f   :  { %v1048_v2 = vpop.permute.xlu1 %1047 }
0x1150   :  { %v1050_v3 = vmul.f32 %v1587_v1, %v1048_v2 }
0x1152   :  { %1052 = vrot.lane.b32.xlu0 %v1050_v3, %s1601_s4 }
0x1156   :  { %1063 = vrot.lane.b32.xlu0 %v964_v57, %s1604_s2 }
0x11c4   :  { %v1053_v4 = vpop.permute.xlu0 %1052 }
0x11c5   :  { %v1055_v5 = vadd.f32 %v1053_v4, %v1915_v32 }
0x11c7   :  { %1588 = vtanh.f32 %v1055_v5 }
0x11c8   :  { %v1064_v9 = vpop.permute.xlu0 %1063 }
0x11c9   :  { %v1066_v15 = vmul.f32 %v1587_v1, %v1064_v9 }
0x11d4   :  { %v1589_v7 = vpop.eup %1588 }
0x11d5   :  { %1059 = vrot.lane.b32.xlu1 %v1589_v7, %s1602_s16 }
0x1247   :  { %v1060_v13 = vpop.permute.xlu1 %1059 }
0x1248   :  { %v1062_v16 = vmul.f32 %v1060_v13, %v1057_v11 }
0x124a   :  { %v1067_v17 = vadd.f32 %v1066_v15, %v1062_v16 }
0x124c   :  { %1069 = vrot.lane.b32.xlu1 %v1067_v17, %s1602_s16 }
0x12be   :  { %v1070_v20 = vpop.permute.xlu1 %1069 }
0x12bf   :  { %v1072_v32 = vsel %vm308_vm0, %v1070_v20, 0.0  ;;  %v1073_v22 = vsel %vm308_vm0, %v1070_v20, %v964_v57 }
0x12c0   :  { %1520 = vmatmul.mubr.msk.f32.vlgmr.msra.gmra.mxu0 %vm311_vm9, %v1073_v22  ;;  %v1185_v23 = vsel %vm1183_vm4, %v1811_v24, %v1072_v32  ;;  %v1190_v29 = vsel %vm1183_vm4, %v1072_v32, %v1811_v24 }
0x1380   :  { %v1143_v30 = vpop.f32.mrf.mxu0 }
0x1381   :  { %v1154_v35 = vadd.f32 %v1143_v30, %v1755_v26  ;;  %v1147_v38 = vadd.f32 %v1913_v31, %v1143_v30 }
0x1382   :  { %v1521_v37 = vpop.f32.mrf.mxu0 }
0x1383   :  { %1156 = vrot.lane.b32.xlu0 %v1154_v35, %s1601_s4  ;;  %v1351_v6 = vmul.f32 -1.442695, %v1147_v38 }
0x1385   :  { %1590 = vpow2.f32 %v1351_v6 }
0x1392   :  { %v1591_v39 = vpop.eup %1590 }
0x1393   :  { %v1151_v40 = vadd.f32 1.0, %v1591_v39 }
0x1395   :  { %1592 = vrcp.f32 %v1151_v40 }
0x13a2   :  { %v1593_v10 = vpop.eup %1592 }
0x13a3   :  { %v1166_v45 = vsub.f32 1.0, %v1593_v10 }
0x13f5   :  { %v1157_v41 = vpop.permute.xlu0 %1156 }
0x13f6   :  { %v1159_v42 = vmul.f32 %v1593_v10, %v1157_v41 }
0x13f8   :  { %1161 = vrot.lane.b32.xlu1 %v1159_v42, %s1601_s4 }
0x13fc   :  { %1172 = vrot.lane.b32.xlu1 %v1073_v22, %s1604_s2 }
0x1400   :  { %1193 = vrot.lane.b32.xlu1 %v1185_v23, %s1604_s2 }
0x1404   :  { %1197 = vrot.lane.b32.xlu1 %v1186_v36, %s1601_s4 }
0x1408   :  { %1201 = vrot.lane.b32.xlu1 %v1954_v33, %s1602_s16  ;;  %v1227_v33 = vld [vmem:[%s2068_s6 + $0x8] sm:$0xff] }
0x1409   :  { %1527 = vmatpush3.msra.mxu1 %v1227_v33 }
0x140a   :  { %1528 = vmatprep.subr.mxu1 %v1599_v8  ;;  %v309_v8 = vsel %vm291_vm8, 7, %v1598_v0 }
0x140b   :  { %vm310_vm10 = vcmp.gt.s32.totalorder %v1768_v48, %v309_v8 }
0x146a   :  { %v1162_v26 = vpop.permute.xlu1 %1161 }
0x146b   :  { %v1164_v24 = vadd.f32 %v1913_v31, %v1162_v26  ;;  %v1226_v31 = vld [vmem:[%s2068_s6] sm:$0xff] }
0x146c   :  { %1529 = vmatpush3.msra.mxu1 %v1226_v31 }
0x146d   :  { %1594 = vtanh.f32 %v1164_v24 }
0x146e   :  { %v1173_v44 = vpop.permute.xlu1 %1172 }
0x146f   :  { %v1175_v47 = vmul.f32 %v1593_v10, %v1173_v44 }
0x1472   :  { %v1194_v51 = vpop.permute.xlu1 %1193 }
0x1476   :  { %v1198_v53 = vpop.permute.xlu1 %1197 }
0x147a   :  { %v1595_v12 = vpop.eup %1594  ;;  %v1202_v0 = vpop.permute.xlu1 %1201 }
0x147b   :  { %1168 = vrot.lane.b32.xlu0 %v1595_v12, %s1602_s16 }
0x14ed   :  { %v1169_v46 = vpop.permute.xlu0 %1168 }
0x14ee   :  { %v1171_v49 = vmul.f32 %v1169_v46, %v1166_v45 }
0x14f0   :  { %v1176_v50 = vadd.f32 %v1175_v47, %v1171_v49 }
0x14f2   :  { %1178 = vrot.lane.b32.xlu0 %v1176_v50, %s1602_s16 }
0x14f6   :  { %1205 = vrot.lane.b32.xlu0 %v1986_v58, %s1604_s2 }
0x14fa   :  { %1209 = vrot.lane.b32.xlu0 %v1190_v29, %s1601_s4 }
0x1564   :  { %v1179_v54 = vpop.permute.xlu0 %1178 }
0x1565   :  { %v1181_v55 = vsel %vm310_vm10, %v1179_v54, 0.0  ;;  %v1182_v25 = vsel %vm310_vm10, %v1179_v54, %v1073_v22 }
0x1566   :  { %v1184_v56 = vsel %vm1183_vm4, %v1773_v52, %v1181_v55  ;;  %1531 = vmatmul.mubr.msk.f32.vlgmr.msra.gmra.mxu1 %vm311_vm9, %v1182_v25  ;;  %v1191_v57 = vsel %vm1183_vm4, %v1181_v55, %v1773_v52 }
0x1567   :  { %v1216_v36 = vsel %vm311_vm9, %v1184_v56, %v1194_v51  ;;  %1213 = vrot.lane.b32.xlu0 %v1191_v57, %s1602_s16 }
0x1568   :  { %v1206_v21 = vpop.permute.xlu0 %1205  ;;  %v1218_v48 = vsel %vm1217_vm11, %v1216_v36, %v1198_v53 }
0x1569   :  { %v1220_v58 = vsel %vm1219_vm12, %v1218_v48, %v1202_v0  ;;  %v1221_v59 = vsel %vm311_vm9, %v1957_v34, %v1206_v21 }
0x156a   :  { %1224 = vst [vmem:[%s2069_s8] sm:$0xff] %v1220_v58 }
0x156c   :  { %v1210_v60 = vpop.permute.xlu0 %1209 }
0x156d   :  { %v1222_v61 = vsel %vm1217_vm11, %v1221_v59, %v1210_v60 }
0x15d9   :  { %v1214_v27 = vpop.permute.xlu0 %1213 }
0x15da   :  { %v1223_v52 = vsel %vm1219_vm12, %v1222_v61, %v1214_v27 }
0x15db   :  { %1225 = vst [vmem:[%s2069_s8 + $0x8] sm:$0xff] %v1223_v52 }
0x1626   :  { %v1306_v62 = vpop.f32.mrf.mxu1 }
0x1627   :  { %v1307_v63 = vadd.f32 %v1352_v28, %v1306_v62 }
0x1628   :  { %v1532_v1 = vpop.f32.mrf.mxu1 }
0x1629   :  { %1596 = vtanh.f32 %v1307_v63 }
0x1636   :  { %v1597_v2 = vpop.eup %1596 }
0x1637   :  { %1311 = vst.msk [vmem:[%s2071_s9] sm:$0xff] %vm1183_vm4, %v1597_v2 }

</bundles_post_ra>
